<compile_context>
chip_gen: v7x
topology: tpu7x:2x2x1
jax: 0.10.0
libtpu: 0.0.40
codegen_flags: <defaults>
</compile_context>

<pallas_src>
import numpy as np
import jax
import jax.numpy as jnp
from jax import lax
from jax.experimental import pallas as pl
from jax.experimental.pallas import tpu as pltpu

LANE = 128      # lane width (last dim alignment)
SUBLANE = 8     # sublane count (second-last dim alignment)


def _round_up(x, m):
    return ((x + m - 1) // m) * m


def _vmem_bytes(shape, itemsize=4):
    """Rough (8,128)-padded VMEM footprint of one f32 buffer."""
    s = list(shape)
    s[-1] = _round_up(s[-1], LANE)
    if len(s) >= 2:
        s[-2] = _round_up(s[-2], SUBLANE)
    n = 1
    for d in s:
        n *= int(d)
    return n * itemsize


# ------------------------- fused LSTM stack + FC kernel -------------------------

def fused_lstm_fc_kernel(x_ref, wih_ref, whh_ref, b_ref, wfc_ref, bfc_ref,
                         out_ref, gx_sc, seq_sc):
    # x_ref:   (T, Bp, F)   time-major, feature-padded input sequence
    # wih_ref: (L, F, G)    input->gate weights; layer k>=1 uses only rows [0:H]
    # whh_ref: (L, H, G)    hidden->gate weights
    # b_ref:   (L, 1, G)    combined bias (b_ih + b_hh)
    #                       (i/f/o columns of W_ih, W_hh, bias pre-scaled by 0.5)
    # wfc_ref: (H, Cp)      final Linear weight
    # bfc_ref: (1, Cp)      final Linear bias
    # out_ref: (Bp, Cp)     logits (only the last time step is written out)
    # gx_sc:   (T, Bp, G)   VMEM scratch: hoisted x @ W_ih for the current layer
    # seq_sc:  (T, Bp, H)   VMEM scratch: inter-layer hidden sequence (exact width H)
    T, Bp, F = x_ref.shape
    L, H, G = whh_ref.shape

    h_last = None
    for k in range(L):                  # layer loop is static (unrolled at trace time)
        # ---- hoisted input projection: one MXU matmul over the whole sequence ----
        if k == 0:
            inp2d = x_ref[...].reshape(T * Bp, F)       # contract over padded D
            w_in = wih_ref[k]                           # (F, G)
        else:
            inp2d = seq_sc[...].reshape(T * Bp, H)      # contract over exactly H
            w_in = wih_ref[k, 0:H, :]                   # (H, G), static slice
        gx = jnp.dot(inp2d, w_in, preferred_element_type=jnp.float32) + b_ref[k]
        gx_sc[...] = gx.reshape(T, Bp, G)

        whh_k = whh_ref[k]                              # (H, G), hoisted out of the loop
        last_layer = (k == L - 1)

        # ---- serial recurrence: h_prev @ W_hh (1 column tile) + one tanh per step ----
        def step(t, carry, whh_k=whh_k, last_layer=last_layer):
            h_prev, c_prev = carry
            gates = gx_sc[t] + jnp.dot(h_prev, whh_k,
                                       preferred_element_type=jnp.float32)
            t_all = jnp.tanh(gates)                     # single full-width EUP op
            # i/f/o pre-activations were pre-scaled by 0.5 in the weights, so
            # sigmoid(a) == 0.5 * (tanh(0.5 a) + 1) == 0.5 * (t_all_slice + 1).
            i_g = t_all[:, 0 * H:1 * H] * 0.5 + 0.5
            f_g = t_all[:, 1 * H:2 * H] * 0.5 + 0.5
            g_g = t_all[:, 2 * H:3 * H]
            o_g = t_all[:, 3 * H:4 * H] * 0.5 + 0.5
            c_new = f_g * c_prev + i_g * g_g
            h_new = o_g * jnp.tanh(c_new)
            if not last_layer:
                seq_sc[t] = h_new                       # feed the next layer
            return (h_new, c_new)

        h0 = jnp.zeros((Bp, H), jnp.float32)
        c0 = jnp.zeros((Bp, H), jnp.float32)
        h_last, _ = lax.fori_loop(0, T, step, (h0, c0), unroll=min(T, 8))

    # ---- fused final Linear on the last time step of the last layer ----
    out_ref[...] = (jnp.dot(h_last, wfc_ref[...],
                            preferred_element_type=jnp.float32) + bfc_ref[...])


# ------------------------------- host-side wrapper -------------------------------

def _pack_gates(w2d, H, G):
    """(rows, 4H) with gate order i,f,g,o -> (rows, G): scale the i/f/o gate columns
    by 0.5 (single-tanh trick) and zero-pad the whole 4H block up to G lanes."""
    rows = w2d.shape[0]
    w4 = w2d.reshape(rows, 4, H)
    scale = jnp.array([0.5, 0.5, 1.0, 0.5], w2d.dtype).reshape(1, 4, 1)
    w4 = w4 * scale
    out = w4.reshape(rows, 4 * H)
    return jnp.pad(out, ((0, 0), (0, G - 4 * H)))


def rnn_forward(x, lstm_params, w_fc, b_fc):
    """x: (B, T, input_size), batch_first (like the PyTorch module).
    lstm_params: list of (w_ih (4H, d_in), w_hh (4H, H), b_ih (4H,), b_hh (4H,))
    in PyTorch layout. w_fc: (C, H), b_fc: (C,). Returns (B, C) logits."""
    B, T, D = x.shape
    H = lstm_params[0][1].shape[1]
    C = w_fc.shape[0]
    L = len(lstm_params)

    G = _round_up(4 * H, LANE)          # whole-gate-block lane padding (no per-gate pad)
    F = max(_round_up(D, LANE), H)      # layer-0 feature width (layers >=1 use H rows)
    Bp = _round_up(B, SUBLANE)
    Cp = _round_up(C, LANE)

    # pack_padded_sequence with full lengths is a no-op -> just run the LSTM.
    # Time-major + zero-pad in one fused XLA pass.
    x_p = jnp.pad(jnp.transpose(x, (1, 0, 2)),
                  ((0, 0), (0, Bp - B), (0, F - D)))

    wih_l, whh_l, b_l = [], [], []
    for k, (w_ih, w_hh, b_ih, b_hh) in enumerate(lstm_params):
        d_in = D if k == 0 else H
        wih_p = _pack_gates(w_ih.T, H, G)                       # (d_in, G)
        wih_p = jnp.pad(wih_p, ((0, F - d_in), (0, 0)))         # (F, G)
        whh_p = _pack_gates(w_hh.T, H, G)                       # (H, G)
        bias_p = _pack_gates((b_ih + b_hh).reshape(1, 4 * H), H, G)  # (1, G)
        wih_l.append(wih_p)
        whh_l.append(whh_p)
        b_l.append(bias_p)
    wih_s = jnp.stack(wih_l)                                    # (L, F, G)
    whh_s = jnp.stack(whh_l)                                    # (L, H, G)
    b_s = jnp.stack(b_l)                                        # (L, 1, G)

    wfc_p = jnp.pad(w_fc.T, ((0, 0), (0, Cp - C)))              # (H, Cp)
    bfc_p = jnp.pad(b_fc.reshape(1, C), ((0, 0), (0, Cp - C)))  # (1, Cp)

    # Explicit VMEM budget sized from the actual buffers (inputs/outputs counted
    # twice for double-buffering headroom), instead of the scoped default.
    io_bytes = sum(_vmem_bytes(s) for s in
                   [(T, Bp, F), (L, F, G), (L, H, G), (L, 1, G),
                    (H, Cp), (1, Cp), (Bp, Cp)])
    scratch_bytes = _vmem_bytes((T, Bp, G)) + _vmem_bytes((T, Bp, H))
    vmem_limit = int(min(max(2 * io_bytes + scratch_bytes + (1 << 20), 8 << 20),
                         64 << 20))

    out_p = pl.pallas_call(
        fused_lstm_fc_kernel,
        out_shape=jax.ShapeDtypeStruct((Bp, Cp), jnp.float32),
        grid_spec=pltpu.PrefetchScalarGridSpec(
            num_scalar_prefetch=0,
            grid=(1,),                       # single invocation; recurrence is in-kernel
            in_specs=[
                pl.BlockSpec((T, Bp, F), lambda i: (0, 0, 0)),
                pl.BlockSpec((L, F, G), lambda i: (0, 0, 0)),
                pl.BlockSpec((L, H, G), lambda i: (0, 0, 0)),
                pl.BlockSpec((L, 1, G), lambda i: (0, 0, 0)),
                pl.BlockSpec((H, Cp), lambda i: (0, 0)),
                pl.BlockSpec((1, Cp), lambda i: (0, 0)),
            ],
            out_specs=pl.BlockSpec((Bp, Cp), lambda i: (0, 0)),
            scratch_shapes=[
                pltpu.VMEM((T, Bp, G), jnp.float32),   # gx: hoisted x @ W_ih
                pltpu.VMEM((T, Bp, H), jnp.float32),   # inter-layer hidden sequence
            ],
        ),
        compiler_params=pltpu.CompilerParams(
            dimension_semantics=("arbitrary",),
            vmem_limit_bytes=vmem_limit),
    )(x_p, wih_s, whh_s, b_s, wfc_p, bfc_p)

    return out_p[:B, :C]


# ---------------------------------- JAX reference ----------------------------------

def rnn_forward_ref(x, lstm_params, w_fc, b_fc):
    B, T, _ = x.shape
    h_seq = jnp.transpose(x, (1, 0, 2))                       # (T, B, D)
    for (w_ih, w_hh, b_ih, b_hh) in lstm_params:
        H = w_hh.shape[1]
        wih_t, whh_t, bias = w_ih.T, w_hh.T, b_ih + b_hh

        def step(carry, x_t, wih_t=wih_t, whh_t=whh_t, bias=bias, H=H):
            h, c = carry
            gates = x_t @ wih_t + h @ whh_t + bias
            i = jax.nn.sigmoid(gates[:, 0 * H:1 * H])
            f = jax.nn.sigmoid(gates[:, 1 * H:2 * H])
            g = jnp.tanh(gates[:, 2 * H:3 * H])
            o = jax.nn.sigmoid(gates[:, 3 * H:4 * H])
            c = f * c + i * g
            h = o * jnp.tanh(c)
            return (h, c), h

        init = (jnp.zeros((B, H), jnp.float32), jnp.zeros((B, H), jnp.float32))
        _, hs = lax.scan(step, init, h_seq)
        h_seq = hs
    return h_seq[-1] @ w_fc.T + b_fc


# -------------------------------------- main --------------------------------------

if __name__ == "__main__":
    batch = 2
    seq = 8
    input_size = 16
    hidden_size = 32
    layer_size = 2
    class_size = 4

    key = jax.random.PRNGKey(0)
    bound = 1.0 / np.sqrt(hidden_size)        # PyTorch default uniform init range

    lstm_params = []
    for layer in range(layer_size):
        d_in = input_size if layer == 0 else hidden_size
        key, k1, k2, k3, k4 = jax.random.split(key, 5)
        w_ih = jax.random.uniform(k1, (4 * hidden_size, d_in), jnp.float32, -bound, bound)
        w_hh = jax.random.uniform(k2, (4 * hidden_size, hidden_size), jnp.float32, -bound, bound)
        b_ih = jax.random.uniform(k3, (4 * hidden_size,), jnp.float32, -bound, bound)
        b_hh = jax.random.uniform(k4, (4 * hidden_size,), jnp.float32, -bound, bound)
        lstm_params.append((w_ih, w_hh, b_ih, b_hh))

    key, k5, k6, kx = jax.random.split(key, 4)
    w_fc = jax.random.uniform(k5, (class_size, hidden_size), jnp.float32, -bound, bound)
    b_fc = jax.random.uniform(k6, (class_size,), jnp.float32, -bound, bound)

    x = jax.random.normal(kx, (batch, seq, input_size), jnp.float32)

    fwd = jax.jit(rnn_forward)
    out = jax.block_until_ready(fwd(x, lstm_params, w_fc, b_fc))

    ref = rnn_forward_ref(x, lstm_params, w_fc, b_fc)
    np.testing.assert_allclose(np.asarray(out), np.asarray(ref), rtol=1e-4, atol=1e-4)
    assert out.shape == (batch, class_size)
    print("KERNEL_OK")
</pallas_src>

<mosaic_0001>
module attributes {stable_mosaic.version = 11 : i64} {
  func.func @fused_lstm_fc_kernel(%arg0: i32, %arg1: memref<8x8x128xf32, #tpu.memory_space<vmem>>, %arg2: memref<2x128x128xf32, #tpu.memory_space<vmem>>, %arg3: memref<2x32x128xf32, #tpu.memory_space<vmem>>, %arg4: memref<2x1x128xf32, #tpu.memory_space<vmem>>, %arg5: memref<32x128xf32, #tpu.memory_space<vmem>>, %arg6: memref<1x128xf32, #tpu.memory_space<vmem>>, %arg7: memref<8x128xf32, #tpu.memory_space<vmem>>, %arg8: memref<8x8x128xf32, #tpu.memory_space<vmem>>, %arg9: memref<8x8x32xf32, #tpu.memory_space<vmem>>) attributes {dimension_semantics = [#tpu.dimension_semantics<arbitrary>], iteration_bounds = array<i64: 1>, scalar_prefetch = 0 : i64, scratch_operands = 2 : i64, tpu.core_type = #tpu.core_type<tc>, window_params = [{pipeline_mode = #tpu.pipeline_mode<synchronous>, transform_indices = @transform_0, window_bounds = array<i64: 8, 8, 128>}, {pipeline_mode = #tpu.pipeline_mode<synchronous>, transform_indices = @transform_1, window_bounds = array<i64: 2, 128, 128>}, {pipeline_mode = #tpu.pipeline_mode<synchronous>, transform_indices = @transform_2, window_bounds = array<i64: 2, 32, 128>}, {pipeline_mode = #tpu.pipeline_mode<synchronous>, transform_indices = @transform_3, window_bounds = array<i64: 2, 1, 128>}, {pipeline_mode = #tpu.pipeline_mode<synchronous>, transform_indices = @transform_4, window_bounds = array<i64: 32, 128>}, {pipeline_mode = #tpu.pipeline_mode<synchronous>, transform_indices = @transform_5, window_bounds = array<i64: 1, 128>}, {pipeline_mode = #tpu.pipeline_mode<synchronous>, transform_indices = @transform_6, window_bounds = array<i64: 8, 128>}]} {
    %c0 = arith.constant 0 : index
    %c0_0 = arith.constant 0 : index
    %c0_1 = arith.constant 0 : index
    %0 = vector.load %arg1[%c0, %c0_0, %c0_1] : memref<8x8x128xf32, #tpu.memory_space<vmem>>, vector<8x8x128xf32>
    %1 = vector.shape_cast %0 : vector<8x8x128xf32> to vector<64x128xf32>
    %c0_2 = arith.constant 0 : index
    %c0_3 = arith.constant 0 : index
    %c0_4 = arith.constant 0 : index
    %2 = vector.load %arg2[%c0_2, %c0_3, %c0_4] : memref<2x128x128xf32, #tpu.memory_space<vmem>>, vector<1x128x128xf32>
    %3 = vector.shape_cast %2 : vector<1x128x128xf32> to vector<128x128xf32>
    %cst = arith.constant dense<0.000000e+00> : vector<64x128xf32>
    %4 = tpu.matmul %1, %3, %cst {dimension_numbers = #tpu.dot_dimension_numbers<[1], [0], [0], [1], [0, 0, 1, 1], [], []>} : vector<64x128xf32>, vector<128x128xf32>, vector<64x128xf32> -> vector<64x128xf32>
    %c0_5 = arith.constant 0 : index
    %c0_6 = arith.constant 0 : index
    %c0_7 = arith.constant 0 : index
    %5 = vector.load %arg4[%c0_5, %c0_6, %c0_7] : memref<2x1x128xf32, #tpu.memory_space<vmem>>, vector<1x1x128xf32>
    %6 = vector.shape_cast %5 : vector<1x1x128xf32> to vector<1x128xf32>
    %7 = vector.broadcast %6 : vector<1x128xf32> to vector<64x128xf32>
    %8 = arith.addf %4, %7 : vector<64x128xf32>
    %9 = vector.shape_cast %8 : vector<64x128xf32> to vector<8x8x128xf32>
    %c0_8 = arith.constant 0 : index
    %c0_9 = arith.constant 0 : index
    %c0_10 = arith.constant 0 : index
    %10 = vector.load %arg8[%c0_8, %c0_9, %c0_10] : memref<8x8x128xf32, #tpu.memory_space<vmem>>, vector<8x8x128xf32>
    tpu.vector_store %arg8[%c0_8, %c0_9, %c0_10], %9 {strides = array<i32>} : memref<8x8x128xf32, #tpu.memory_space<vmem>>, vector<8x8x128xf32>,
    %c0_11 = arith.constant 0 : index
    %c0_12 = arith.constant 0 : index
    %c0_13 = arith.constant 0 : index
    %11 = vector.load %arg3[%c0_11, %c0_12, %c0_13] : memref<2x32x128xf32, #tpu.memory_space<vmem>>, vector<1x32x128xf32>
    %12 = vector.shape_cast %11 : vector<1x32x128xf32> to vector<32x128xf32>
    %cst_14 = arith.constant 0.000000e+00 : f32
    %13 = vector.broadcast %cst_14 : f32 to vector<8x32xf32>
    %cst_15 = arith.constant 0.000000e+00 : f32
    %14 = vector.broadcast %cst_15 : f32 to vector<8x32xf32>
    %c0_i32 = arith.constant 0 : i32
    %15 = arith.index_cast %c0_i32 : i32 to index
    %c0_16 = arith.constant 0 : index
    %c0_17 = arith.constant 0 : index
    %16 = vector.load %arg8[%15, %c0_16, %c0_17] : memref<8x8x128xf32, #tpu.memory_space<vmem>>, vector<1x8x128xf32>
    %17 = vector.shape_cast %16 : vector<1x8x128xf32> to vector<8x128xf32>
    %cst_18 = arith.constant dense<0.000000e+00> : vector<8x128xf32>
    %18 = tpu.matmul %13, %12, %cst_18 {dimension_numbers = #tpu.dot_dimension_numbers<[1], [0], [0], [1], [0, 0, 1, 1], [], []>} : vector<8x32xf32>, vector<32x128xf32>, vector<8x128xf32> -> vector<8x128xf32>
    %19 = arith.addf %17, %18 : vector<8x128xf32>
    %20 = math.tanh %19 : vector<8x128xf32>
    %21 = vector.extract_strided_slice %20 {offsets = [0, 0], sizes = [8, 32], strides = [1, 1]} : vector<8x128xf32> to vector<8x32xf32>
    %cst_19 = arith.constant 5.000000e-01 : f32
    %22 = vector.broadcast %cst_19 : f32 to vector<8x32xf32>
    %23 = arith.mulf %21, %22 : vector<8x32xf32>
    %cst_20 = arith.constant 5.000000e-01 : f32
    %24 = vector.broadcast %cst_20 : f32 to vector<8x32xf32>
    %25 = arith.addf %23, %24 : vector<8x32xf32>
    %26 = vector.extract_strided_slice %20 {offsets = [0, 32], sizes = [8, 32], strides = [1, 1]} : vector<8x128xf32> to vector<8x32xf32>
    %cst_21 = arith.constant 5.000000e-01 : f32
    %27 = vector.broadcast %cst_21 : f32 to vector<8x32xf32>
    %28 = arith.mulf %26, %27 : vector<8x32xf32>
    %cst_22 = arith.constant 5.000000e-01 : f32
    %29 = vector.broadcast %cst_22 : f32 to vector<8x32xf32>
    %30 = arith.addf %28, %29 : vector<8x32xf32>
    %31 = vector.extract_strided_slice %20 {offsets = [0, 64], sizes = [8, 32], strides = [1, 1]} : vector<8x128xf32> to vector<8x32xf32>
    %32 = vector.extract_strided_slice %20 {offsets = [0, 96], sizes = [8, 32], strides = [1, 1]} : vector<8x128xf32> to vector<8x32xf32>
    %cst_23 = arith.constant 5.000000e-01 : f32
    %33 = vector.broadcast %cst_23 : f32 to vector<8x32xf32>
    %34 = arith.mulf %32, %33 : vector<8x32xf32>
    %cst_24 = arith.constant 5.000000e-01 : f32
    %35 = vector.broadcast %cst_24 : f32 to vector<8x32xf32>
    %36 = arith.addf %34, %35 : vector<8x32xf32>
    %37 = arith.mulf %30, %14 : vector<8x32xf32>
    %38 = arith.mulf %25, %31 : vector<8x32xf32>
    %39 = arith.addf %37, %38 : vector<8x32xf32>
    %40 = math.tanh %39 : vector<8x32xf32>
    %41 = arith.mulf %36, %40 : vector<8x32xf32>
    %42 = arith.index_cast %c0_i32 : i32 to index
    %c0_25 = arith.constant 0 : index
    %c0_26 = arith.constant 0 : index
    %43 = vector.load %arg9[%42, %c0_25, %c0_26] : memref<8x8x32xf32, #tpu.memory_space<vmem>>, vector<1x8x32xf32>
    %44 = vector.shape_cast %43 : vector<1x8x32xf32> to vector<8x32xf32>
    %45 = vector.shape_cast %41 : vector<8x32xf32> to vector<1x8x32xf32>
    tpu.vector_store %arg9[%42, %c0_25, %c0_26], %45 {strides = array<i32>} : memref<8x8x32xf32, #tpu.memory_space<vmem>>, vector<1x8x32xf32>,
    %c1_i32 = arith.constant 1 : i32
    %46 = arith.index_cast %c1_i32 : i32 to index
    %c0_27 = arith.constant 0 : index
    %c0_28 = arith.constant 0 : index
    %47 = vector.load %arg8[%46, %c0_27, %c0_28] : memref<8x8x128xf32, #tpu.memory_space<vmem>>, vector<1x8x128xf32>
    %48 = vector.shape_cast %47 : vector<1x8x128xf32> to vector<8x128xf32>
    %cst_29 = arith.constant dense<0.000000e+00> : vector<8x128xf32>
    %49 = tpu.matmul %41, %12, %cst_29 {dimension_numbers = #tpu.dot_dimension_numbers<[1], [0], [0], [1], [0, 0, 1, 1], [], []>} : vector<8x32xf32>, vector<32x128xf32>, vector<8x128xf32> -> vector<8x128xf32>
    %50 = arith.addf %48, %49 : vector<8x128xf32>
    %51 = math.tanh %50 : vector<8x128xf32>
    %52 = vector.extract_strided_slice %51 {offsets = [0, 0], sizes = [8, 32], strides = [1, 1]} : vector<8x128xf32> to vector<8x32xf32>
    %cst_30 = arith.constant 5.000000e-01 : f32
    %53 = vector.broadcast %cst_30 : f32 to vector<8x32xf32>
    %54 = arith.mulf %52, %53 : vector<8x32xf32>
    %cst_31 = arith.constant 5.000000e-01 : f32
    %55 = vector.broadcast %cst_31 : f32 to vector<8x32xf32>
    %56 = arith.addf %54, %55 : vector<8x32xf32>
    %57 = vector.extract_strided_slice %51 {offsets = [0, 32], sizes = [8, 32], strides = [1, 1]} : vector<8x128xf32> to vector<8x32xf32>
    %cst_32 = arith.constant 5.000000e-01 : f32
    %58 = vector.broadcast %cst_32 : f32 to vector<8x32xf32>
    %59 = arith.mulf %57, %58 : vector<8x32xf32>
    %cst_33 = arith.constant 5.000000e-01 : f32
    %60 = vector.broadcast %cst_33 : f32 to vector<8x32xf32>
    %61 = arith.addf %59, %60 : vector<8x32xf32>
    %62 = vector.extract_strided_slice %51 {offsets = [0, 64], sizes = [8, 32], strides = [1, 1]} : vector<8x128xf32> to vector<8x32xf32>
    %63 = vector.extract_strided_slice %51 {offsets = [0, 96], sizes = [8, 32], strides = [1, 1]} : vector<8x128xf32> to vector<8x32xf32>
    %cst_34 = arith.constant 5.000000e-01 : f32
    %64 = vector.broadcast %cst_34 : f32 to vector<8x32xf32>
    %65 = arith.mulf %63, %64 : vector<8x32xf32>
    %cst_35 = arith.constant 5.000000e-01 : f32
    %66 = vector.broadcast %cst_35 : f32 to vector<8x32xf32>
    %67 = arith.addf %65, %66 : vector<8x32xf32>
    %68 = arith.mulf %61, %39 : vector<8x32xf32>
    %69 = arith.mulf %56, %62 : vector<8x32xf32>
    %70 = arith.addf %68, %69 : vector<8x32xf32>
    %71 = math.tanh %70 : vector<8x32xf32>
    %72 = arith.mulf %67, %71 : vector<8x32xf32>
    %73 = arith.index_cast %c1_i32 : i32 to index
    %c0_36 = arith.constant 0 : index
    %c0_37 = arith.constant 0 : index
    %74 = vector.load %arg9[%73, %c0_36, %c0_37] : memref<8x8x32xf32, #tpu.memory_space<vmem>>, vector<1x8x32xf32>
    %75 = vector.shape_cast %74 : vector<1x8x32xf32> to vector<8x32xf32>
    %76 = vector.shape_cast %72 : vector<8x32xf32> to vector<1x8x32xf32>
    tpu.vector_store %arg9[%73, %c0_36, %c0_37], %76 {strides = array<i32>} : memref<8x8x32xf32, #tpu.memory_space<vmem>>, vector<1x8x32xf32>,
    %c2_i32 = arith.constant 2 : i32
    %77 = arith.index_cast %c2_i32 : i32 to index
    %c0_38 = arith.constant 0 : index
    %c0_39 = arith.constant 0 : index
    %78 = vector.load %arg8[%77, %c0_38, %c0_39] : memref<8x8x128xf32, #tpu.memory_space<vmem>>, vector<1x8x128xf32>
    %79 = vector.shape_cast %78 : vector<1x8x128xf32> to vector<8x128xf32>
    %cst_40 = arith.constant dense<0.000000e+00> : vector<8x128xf32>
    %80 = tpu.matmul %72, %12, %cst_40 {dimension_numbers = #tpu.dot_dimension_numbers<[1], [0], [0], [1], [0, 0, 1, 1], [], []>} : vector<8x32xf32>, vector<32x128xf32>, vector<8x128xf32> -> vector<8x128xf32>
    %81 = arith.addf %79, %80 : vector<8x128xf32>
    %82 = math.tanh %81 : vector<8x128xf32>
    %83 = vector.extract_strided_slice %82 {offsets = [0, 0], sizes = [8, 32], strides = [1, 1]} : vector<8x128xf32> to vector<8x32xf32>
    %cst_41 = arith.constant 5.000000e-01 : f32
    %84 = vector.broadcast %cst_41 : f32 to vector<8x32xf32>
    %85 = arith.mulf %83, %84 : vector<8x32xf32>
    %cst_42 = arith.constant 5.000000e-01 : f32
    %86 = vector.broadcast %cst_42 : f32 to vector<8x32xf32>
    %87 = arith.addf %85, %86 : vector<8x32xf32>
    %88 = vector.extract_strided_slice %82 {offsets = [0, 32], sizes = [8, 32], strides = [1, 1]} : vector<8x128xf32> to vector<8x32xf32>
    %cst_43 = arith.constant 5.000000e-01 : f32
    %89 = vector.broadcast %cst_43 : f32 to vector<8x32xf32>
    %90 = arith.mulf %88, %89 : vector<8x32xf32>
    %cst_44 = arith.constant 5.000000e-01 : f32
    %91 = vector.broadcast %cst_44 : f32 to vector<8x32xf32>
    %92 = arith.addf %90, %91 : vector<8x32xf32>
    %93 = vector.extract_strided_slice %82 {offsets = [0, 64], sizes = [8, 32], strides = [1, 1]} : vector<8x128xf32> to vector<8x32xf32>
    %94 = vector.extract_strided_slice %82 {offsets = [0, 96], sizes = [8, 32], strides = [1, 1]} : vector<8x128xf32> to vector<8x32xf32>
    %cst_45 = arith.constant 5.000000e-01 : f32
    %95 = vector.broadcast %cst_45 : f32 to vector<8x32xf32>
    %96 = arith.mulf %94, %95 : vector<8x32xf32>
    %cst_46 = arith.constant 5.000000e-01 : f32
    %97 = vector.broadcast %cst_46 : f32 to vector<8x32xf32>
    %98 = arith.addf %96, %97 : vector<8x32xf32>
    %99 = arith.mulf %92, %70 : vector<8x32xf32>
    %100 = arith.mulf %87, %93 : vector<8x32xf32>
    %101 = arith.addf %99, %100 : vector<8x32xf32>
    %102 = math.tanh %101 : vector<8x32xf32>
    %103 = arith.mulf %98, %102 : vector<8x32xf32>
    %104 = arith.index_cast %c2_i32 : i32 to index
    %c0_47 = arith.constant 0 : index
    %c0_48 = arith.constant 0 : index
    %105 = vector.load %arg9[%104, %c0_47, %c0_48] : memref<8x8x32xf32, #tpu.memory_space<vmem>>, vector<1x8x32xf32>
    %106 = vector.shape_cast %105 : vector<1x8x32xf32> to vector<8x32xf32>
    %107 = vector.shape_cast %103 : vector<8x32xf32> to vector<1x8x32xf32>
    tpu.vector_store %arg9[%104, %c0_47, %c0_48], %107 {strides = array<i32>} : memref<8x8x32xf32, #tpu.memory_space<vmem>>, vector<1x8x32xf32>,
    %c3_i32 = arith.constant 3 : i32
    %108 = arith.index_cast %c3_i32 : i32 to index
    %c0_49 = arith.constant 0 : index
    %c0_50 = arith.constant 0 : index
    %109 = vector.load %arg8[%108, %c0_49, %c0_50] : memref<8x8x128xf32, #tpu.memory_space<vmem>>, vector<1x8x128xf32>
    %110 = vector.shape_cast %109 : vector<1x8x128xf32> to vector<8x128xf32>
    %cst_51 = arith.constant dense<0.000000e+00> : vector<8x128xf32>
    %111 = tpu.matmul %103, %12, %cst_51 {dimension_numbers = #tpu.dot_dimension_numbers<[1], [0], [0], [1], [0, 0, 1, 1], [], []>} : vector<8x32xf32>, vector<32x128xf32>, vector<8x128xf32> -> vector<8x128xf32>
    %112 = arith.addf %110, %111 : vector<8x128xf32>
    %113 = math.tanh %112 : vector<8x128xf32>
    %114 = vector.extract_strided_slice %113 {offsets = [0, 0], sizes = [8, 32], strides = [1, 1]} : vector<8x128xf32> to vector<8x32xf32>
    %cst_52 = arith.constant 5.000000e-01 : f32
    %115 = vector.broadcast %cst_52 : f32 to vector<8x32xf32>
    %116 = arith.mulf %114, %115 : vector<8x32xf32>
    %cst_53 = arith.constant 5.000000e-01 : f32
    %117 = vector.broadcast %cst_53 : f32 to vector<8x32xf32>
    %118 = arith.addf %116, %117 : vector<8x32xf32>
    %119 = vector.extract_strided_slice %113 {offsets = [0, 32], sizes = [8, 32], strides = [1, 1]} : vector<8x128xf32> to vector<8x32xf32>
    %cst_54 = arith.constant 5.000000e-01 : f32
    %120 = vector.broadcast %cst_54 : f32 to vector<8x32xf32>
    %121 = arith.mulf %119, %120 : vector<8x32xf32>
    %cst_55 = arith.constant 5.000000e-01 : f32
    %122 = vector.broadcast %cst_55 : f32 to vector<8x32xf32>
    %123 = arith.addf %121, %122 : vector<8x32xf32>
    %124 = vector.extract_strided_slice %113 {offsets = [0, 64], sizes = [8, 32], strides = [1, 1]} : vector<8x128xf32> to vector<8x32xf32>
    %125 = vector.extract_strided_slice %113 {offsets = [0, 96], sizes = [8, 32], strides = [1, 1]} : vector<8x128xf32> to vector<8x32xf32>
    %cst_56 = arith.constant 5.000000e-01 : f32
    %126 = vector.broadcast %cst_56 : f32 to vector<8x32xf32>
    %127 = arith.mulf %125, %126 : vector<8x32xf32>
    %cst_57 = arith.constant 5.000000e-01 : f32
    %128 = vector.broadcast %cst_57 : f32 to vector<8x32xf32>
    %129 = arith.addf %127, %128 : vector<8x32xf32>
    %130 = arith.mulf %123, %101 : vector<8x32xf32>
    %131 = arith.mulf %118, %124 : vector<8x32xf32>
    %132 = arith.addf %130, %131 : vector<8x32xf32>
    %133 = math.tanh %132 : vector<8x32xf32>
    %134 = arith.mulf %129, %133 : vector<8x32xf32>
    %135 = arith.index_cast %c3_i32 : i32 to index
    %c0_58 = arith.constant 0 : index
    %c0_59 = arith.constant 0 : index
    %136 = vector.load %arg9[%135, %c0_58, %c0_59] : memref<8x8x32xf32, #tpu.memory_space<vmem>>, vector<1x8x32xf32>
    %137 = vector.shape_cast %136 : vector<1x8x32xf32> to vector<8x32xf32>
    %138 = vector.shape_cast %134 : vector<8x32xf32> to vector<1x8x32xf32>
    tpu.vector_store %arg9[%135, %c0_58, %c0_59], %138 {strides = array<i32>} : memref<8x8x32xf32, #tpu.memory_space<vmem>>, vector<1x8x32xf32>,
    %c4_i32 = arith.constant 4 : i32
    %139 = arith.index_cast %c4_i32 : i32 to index
    %c0_60 = arith.constant 0 : index
    %c0_61 = arith.constant 0 : index
    %140 = vector.load %arg8[%139, %c0_60, %c0_61] : memref<8x8x128xf32, #tpu.memory_space<vmem>>, vector<1x8x128xf32>
    %141 = vector.shape_cast %140 : vector<1x8x128xf32> to vector<8x128xf32>
    %cst_62 = arith.constant dense<0.000000e+00> : vector<8x128xf32>
    %142 = tpu.matmul %134, %12, %cst_62 {dimension_numbers = #tpu.dot_dimension_numbers<[1], [0], [0], [1], [0, 0, 1, 1], [], []>} : vector<8x32xf32>, vector<32x128xf32>, vector<8x128xf32> -> vector<8x128xf32>
    %143 = arith.addf %141, %142 : vector<8x128xf32>
    %144 = math.tanh %143 : vector<8x128xf32>
    %145 = vector.extract_strided_slice %144 {offsets = [0, 0], sizes = [8, 32], strides = [1, 1]} : vector<8x128xf32> to vector<8x32xf32>
    %cst_63 = arith.constant 5.000000e-01 : f32
    %146 = vector.broadcast %cst_63 : f32 to vector<8x32xf32>
    %147 = arith.mulf %145, %146 : vector<8x32xf32>
    %cst_64 = arith.constant 5.000000e-01 : f32
    %148 = vector.broadcast %cst_64 : f32 to vector<8x32xf32>
    %149 = arith.addf %147, %148 : vector<8x32xf32>
    %150 = vector.extract_strided_slice %144 {offsets = [0, 32], sizes = [8, 32], strides = [1, 1]} : vector<8x128xf32> to vector<8x32xf32>
    %cst_65 = arith.constant 5.000000e-01 : f32
    %151 = vector.broadcast %cst_65 : f32 to vector<8x32xf32>
    %152 = arith.mulf %150, %151 : vector<8x32xf32>
    %cst_66 = arith.constant 5.000000e-01 : f32
    %153 = vector.broadcast %cst_66 : f32 to vector<8x32xf32>
    %154 = arith.addf %152, %153 : vector<8x32xf32>
    %155 = vector.extract_strided_slice %144 {offsets = [0, 64], sizes = [8, 32], strides = [1, 1]} : vector<8x128xf32> to vector<8x32xf32>
    %156 = vector.extract_strided_slice %144 {offsets = [0, 96], sizes = [8, 32], strides = [1, 1]} : vector<8x128xf32> to vector<8x32xf32>
    %cst_67 = arith.constant 5.000000e-01 : f32
    %157 = vector.broadcast %cst_67 : f32 to vector<8x32xf32>
    %158 = arith.mulf %156, %157 : vector<8x32xf32>
    %cst_68 = arith.constant 5.000000e-01 : f32
    %159 = vector.broadcast %cst_68 : f32 to vector<8x32xf32>
    %160 = arith.addf %158, %159 : vector<8x32xf32>
    %161 = arith.mulf %154, %132 : vector<8x32xf32>
    %162 = arith.mulf %149, %155 : vector<8x32xf32>
    %163 = arith.addf %161, %162 : vector<8x32xf32>
    %164 = math.tanh %163 : vector<8x32xf32>
    %165 = arith.mulf %160, %164 : vector<8x32xf32>
    %166 = arith.index_cast %c4_i32 : i32 to index
    %c0_69 = arith.constant 0 : index
    %c0_70 = arith.constant 0 : index
    %167 = vector.load %arg9[%166, %c0_69, %c0_70] : memref<8x8x32xf32, #tpu.memory_space<vmem>>, vector<1x8x32xf32>
    %168 = vector.shape_cast %167 : vector<1x8x32xf32> to vector<8x32xf32>
    %169 = vector.shape_cast %165 : vector<8x32xf32> to vector<1x8x32xf32>
    tpu.vector_store %arg9[%166, %c0_69, %c0_70], %169 {strides = array<i32>} : memref<8x8x32xf32, #tpu.memory_space<vmem>>, vector<1x8x32xf32>,
    %c5_i32 = arith.constant 5 : i32
    %170 = arith.index_cast %c5_i32 : i32 to index
    %c0_71 = arith.constant 0 : index
    %c0_72 = arith.constant 0 : index
    %171 = vector.load %arg8[%170, %c0_71, %c0_72] : memref<8x8x128xf32, #tpu.memory_space<vmem>>, vector<1x8x128xf32>
    %172 = vector.shape_cast %171 : vector<1x8x128xf32> to vector<8x128xf32>
    %cst_73 = arith.constant dense<0.000000e+00> : vector<8x128xf32>
    %173 = tpu.matmul %165, %12, %cst_73 {dimension_numbers = #tpu.dot_dimension_numbers<[1], [0], [0], [1], [0, 0, 1, 1], [], []>} : vector<8x32xf32>, vector<32x128xf32>, vector<8x128xf32> -> vector<8x128xf32>
    %174 = arith.addf %172, %173 : vector<8x128xf32>
    %175 = math.tanh %174 : vector<8x128xf32>
    %176 = vector.extract_strided_slice %175 {offsets = [0, 0], sizes = [8, 32], strides = [1, 1]} : vector<8x128xf32> to vector<8x32xf32>
    %cst_74 = arith.constant 5.000000e-01 : f32
    %177 = vector.broadcast %cst_74 : f32 to vector<8x32xf32>
    %178 = arith.mulf %176, %177 : vector<8x32xf32>
    %cst_75 = arith.constant 5.000000e-01 : f32
    %179 = vector.broadcast %cst_75 : f32 to vector<8x32xf32>
    %180 = arith.addf %178, %179 : vector<8x32xf32>
    %181 = vector.extract_strided_slice %175 {offsets = [0, 32], sizes = [8, 32], strides = [1, 1]} : vector<8x128xf32> to vector<8x32xf32>
    %cst_76 = arith.constant 5.000000e-01 : f32
    %182 = vector.broadcast %cst_76 : f32 to vector<8x32xf32>
    %183 = arith.mulf %181, %182 : vector<8x32xf32>
    %cst_77 = arith.constant 5.000000e-01 : f32
    %184 = vector.broadcast %cst_77 : f32 to vector<8x32xf32>
    %185 = arith.addf %183, %184 : vector<8x32xf32>
    %186 = vector.extract_strided_slice %175 {offsets = [0, 64], sizes = [8, 32], strides = [1, 1]} : vector<8x128xf32> to vector<8x32xf32>
    %187 = vector.extract_strided_slice %175 {offsets = [0, 96], sizes = [8, 32], strides = [1, 1]} : vector<8x128xf32> to vector<8x32xf32>
    %cst_78 = arith.constant 5.000000e-01 : f32
    %188 = vector.broadcast %cst_78 : f32 to vector<8x32xf32>
    %189 = arith.mulf %187, %188 : vector<8x32xf32>
    %cst_79 = arith.constant 5.000000e-01 : f32
    %190 = vector.broadcast %cst_79 : f32 to vector<8x32xf32>
    %191 = arith.addf %189, %190 : vector<8x32xf32>
    %192 = arith.mulf %185, %163 : vector<8x32xf32>
    %193 = arith.mulf %180, %186 : vector<8x32xf32>
    %194 = arith.addf %192, %193 : vector<8x32xf32>
    %195 = math.tanh %194 : vector<8x32xf32>
    %196 = arith.mulf %191, %195 : vector<8x32xf32>
    %197 = arith.index_cast %c5_i32 : i32 to index
    %c0_80 = arith.constant 0 : index
    %c0_81 = arith.constant 0 : index
    %198 = vector.load %arg9[%197, %c0_80, %c0_81] : memref<8x8x32xf32, #tpu.memory_space<vmem>>, vector<1x8x32xf32>
    %199 = vector.shape_cast %198 : vector<1x8x32xf32> to vector<8x32xf32>
    %200 = vector.shape_cast %196 : vector<8x32xf32> to vector<1x8x32xf32>
    tpu.vector_store %arg9[%197, %c0_80, %c0_81], %200 {strides = array<i32>} : memref<8x8x32xf32, #tpu.memory_space<vmem>>, vector<1x8x32xf32>,
    %c6_i32 = arith.constant 6 : i32
    %201 = arith.index_cast %c6_i32 : i32 to index
    %c0_82 = arith.constant 0 : index
    %c0_83 = arith.constant 0 : index
    %202 = vector.load %arg8[%201, %c0_82, %c0_83] : memref<8x8x128xf32, #tpu.memory_space<vmem>>, vector<1x8x128xf32>
    %203 = vector.shape_cast %202 : vector<1x8x128xf32> to vector<8x128xf32>
    %cst_84 = arith.constant dense<0.000000e+00> : vector<8x128xf32>
    %204 = tpu.matmul %196, %12, %cst_84 {dimension_numbers = #tpu.dot_dimension_numbers<[1], [0], [0], [1], [0, 0, 1, 1], [], []>} : vector<8x32xf32>, vector<32x128xf32>, vector<8x128xf32> -> vector<8x128xf32>
    %205 = arith.addf %203, %204 : vector<8x128xf32>
    %206 = math.tanh %205 : vector<8x128xf32>
    %207 = vector.extract_strided_slice %206 {offsets = [0, 0], sizes = [8, 32], strides = [1, 1]} : vector<8x128xf32> to vector<8x32xf32>
    %cst_85 = arith.constant 5.000000e-01 : f32
    %208 = vector.broadcast %cst_85 : f32 to vector<8x32xf32>
    %209 = arith.mulf %207, %208 : vector<8x32xf32>
    %cst_86 = arith.constant 5.000000e-01 : f32
    %210 = vector.broadcast %cst_86 : f32 to vector<8x32xf32>
    %211 = arith.addf %209, %210 : vector<8x32xf32>
    %212 = vector.extract_strided_slice %206 {offsets = [0, 32], sizes = [8, 32], strides = [1, 1]} : vector<8x128xf32> to vector<8x32xf32>
    %cst_87 = arith.constant 5.000000e-01 : f32
    %213 = vector.broadcast %cst_87 : f32 to vector<8x32xf32>
    %214 = arith.mulf %212, %213 : vector<8x32xf32>
    %cst_88 = arith.constant 5.000000e-01 : f32
    %215 = vector.broadcast %cst_88 : f32 to vector<8x32xf32>
    %216 = arith.addf %214, %215 : vector<8x32xf32>
    %217 = vector.extract_strided_slice %206 {offsets = [0, 64], sizes = [8, 32], strides = [1, 1]} : vector<8x128xf32> to vector<8x32xf32>
    %218 = vector.extract_strided_slice %206 {offsets = [0, 96], sizes = [8, 32], strides = [1, 1]} : vector<8x128xf32> to vector<8x32xf32>
    %cst_89 = arith.constant 5.000000e-01 : f32
    %219 = vector.broadcast %cst_89 : f32 to vector<8x32xf32>
    %220 = arith.mulf %218, %219 : vector<8x32xf32>
    %cst_90 = arith.constant 5.000000e-01 : f32
    %221 = vector.broadcast %cst_90 : f32 to vector<8x32xf32>
    %222 = arith.addf %220, %221 : vector<8x32xf32>
    %223 = arith.mulf %216, %194 : vector<8x32xf32>
    %224 = arith.mulf %211, %217 : vector<8x32xf32>
    %225 = arith.addf %223, %224 : vector<8x32xf32>
    %226 = math.tanh %225 : vector<8x32xf32>
    %227 = arith.mulf %222, %226 : vector<8x32xf32>
    %228 = arith.index_cast %c6_i32 : i32 to index
    %c0_91 = arith.constant 0 : index
    %c0_92 = arith.constant 0 : index
    %229 = vector.load %arg9[%228, %c0_91, %c0_92] : memref<8x8x32xf32, #tpu.memory_space<vmem>>, vector<1x8x32xf32>
    %230 = vector.shape_cast %229 : vector<1x8x32xf32> to vector<8x32xf32>
    %231 = vector.shape_cast %227 : vector<8x32xf32> to vector<1x8x32xf32>
    tpu.vector_store %arg9[%228, %c0_91, %c0_92], %231 {strides = array<i32>} : memref<8x8x32xf32, #tpu.memory_space<vmem>>, vector<1x8x32xf32>,
    %c7_i32 = arith.constant 7 : i32
    %232 = arith.index_cast %c7_i32 : i32 to index
    %c0_93 = arith.constant 0 : index
    %c0_94 = arith.constant 0 : index
    %233 = vector.load %arg8[%232, %c0_93, %c0_94] : memref<8x8x128xf32, #tpu.memory_space<vmem>>, vector<1x8x128xf32>
    %234 = vector.shape_cast %233 : vector<1x8x128xf32> to vector<8x128xf32>
    %cst_95 = arith.constant dense<0.000000e+00> : vector<8x128xf32>
    %235 = tpu.matmul %227, %12, %cst_95 {dimension_numbers = #tpu.dot_dimension_numbers<[1], [0], [0], [1], [0, 0, 1, 1], [], []>} : vector<8x32xf32>, vector<32x128xf32>, vector<8x128xf32> -> vector<8x128xf32>
    %236 = arith.addf %234, %235 : vector<8x128xf32>
    %237 = math.tanh %236 : vector<8x128xf32>
    %238 = vector.extract_strided_slice %237 {offsets = [0, 0], sizes = [8, 32], strides = [1, 1]} : vector<8x128xf32> to vector<8x32xf32>
    %cst_96 = arith.constant 5.000000e-01 : f32
    %239 = vector.broadcast %cst_96 : f32 to vector<8x32xf32>
    %240 = arith.mulf %238, %239 : vector<8x32xf32>
    %cst_97 = arith.constant 5.000000e-01 : f32
    %241 = vector.broadcast %cst_97 : f32 to vector<8x32xf32>
    %242 = arith.addf %240, %241 : vector<8x32xf32>
    %243 = vector.extract_strided_slice %237 {offsets = [0, 32], sizes = [8, 32], strides = [1, 1]} : vector<8x128xf32> to vector<8x32xf32>
    %cst_98 = arith.constant 5.000000e-01 : f32
    %244 = vector.broadcast %cst_98 : f32 to vector<8x32xf32>
    %245 = arith.mulf %243, %244 : vector<8x32xf32>
    %cst_99 = arith.constant 5.000000e-01 : f32
    %246 = vector.broadcast %cst_99 : f32 to vector<8x32xf32>
    %247 = arith.addf %245, %246 : vector<8x32xf32>
    %248 = vector.extract_strided_slice %237 {offsets = [0, 64], sizes = [8, 32], strides = [1, 1]} : vector<8x128xf32> to vector<8x32xf32>
    %249 = vector.extract_strided_slice %237 {offsets = [0, 96], sizes = [8, 32], strides = [1, 1]} : vector<8x128xf32> to vector<8x32xf32>
    %cst_100 = arith.constant 5.000000e-01 : f32
    %250 = vector.broadcast %cst_100 : f32 to vector<8x32xf32>
    %251 = arith.mulf %249, %250 : vector<8x32xf32>
    %cst_101 = arith.constant 5.000000e-01 : f32
    %252 = vector.broadcast %cst_101 : f32 to vector<8x32xf32>
    %253 = arith.addf %251, %252 : vector<8x32xf32>
    %254 = arith.mulf %247, %225 : vector<8x32xf32>
    %255 = arith.mulf %242, %248 : vector<8x32xf32>
    %256 = arith.addf %254, %255 : vector<8x32xf32>
    %257 = math.tanh %256 : vector<8x32xf32>
    %258 = arith.mulf %253, %257 : vector<8x32xf32>
    %259 = arith.index_cast %c7_i32 : i32 to index
    %c0_102 = arith.constant 0 : index
    %c0_103 = arith.constant 0 : index
    %260 = vector.load %arg9[%259, %c0_102, %c0_103] : memref<8x8x32xf32, #tpu.memory_space<vmem>>, vector<1x8x32xf32>
    %261 = vector.shape_cast %260 : vector<1x8x32xf32> to vector<8x32xf32>
    %262 = vector.shape_cast %258 : vector<8x32xf32> to vector<1x8x32xf32>
    tpu.vector_store %arg9[%259, %c0_102, %c0_103], %262 {strides = array<i32>} : memref<8x8x32xf32, #tpu.memory_space<vmem>>, vector<1x8x32xf32>,
    %c8_i32 = arith.constant 8 : i32
    %c0_104 = arith.constant 0 : index
    %c0_105 = arith.constant 0 : index
    %c0_106 = arith.constant 0 : index
    %263 = vector.load %arg9[%c0_104, %c0_105, %c0_106] : memref<8x8x32xf32, #tpu.memory_space<vmem>>, vector<8x8x32xf32>
    %264 = vector.shape_cast %263 : vector<8x8x32xf32> to vector<64x32xf32>
    %c1 = arith.constant 1 : index
    %c0_107 = arith.constant 0 : index
    %c0_108 = arith.constant 0 : index
    %265 = vector.load %arg2[%c1, %c0_107, %c0_108] : memref<2x128x128xf32, #tpu.memory_space<vmem>>, vector<1x32x128xf32>
    %266 = vector.shape_cast %265 : vector<1x32x128xf32> to vector<32x128xf32>
    %cst_109 = arith.constant dense<0.000000e+00> : vector<64x128xf32>
    %267 = tpu.matmul %264, %266, %cst_109 {dimension_numbers = #tpu.dot_dimension_numbers<[1], [0], [0], [1], [0, 0, 1, 1], [], []>} : vector<64x32xf32>, vector<32x128xf32>, vector<64x128xf32> -> vector<64x128xf32>
    %c1_110 = arith.constant 1 : index
    %c0_111 = arith.constant 0 : index
    %c0_112 = arith.constant 0 : index
    %268 = vector.load %arg4[%c1_110, %c0_111, %c0_112] : memref<2x1x128xf32, #tpu.memory_space<vmem>>, vector<1x1x128xf32>
    %269 = vector.shape_cast %268 : vector<1x1x128xf32> to vector<1x128xf32>
    %270 = vector.broadcast %269 : vector<1x128xf32> to vector<64x128xf32>
    %271 = arith.addf %267, %270 : vector<64x128xf32>
    %272 = vector.shape_cast %271 : vector<64x128xf32> to vector<8x8x128xf32>
    %c0_113 = arith.constant 0 : index
    %c0_114 = arith.constant 0 : index
    %c0_115 = arith.constant 0 : index
    %273 = vector.load %arg8[%c0_113, %c0_114, %c0_115] : memref<8x8x128xf32, #tpu.memory_space<vmem>>, vector<8x8x128xf32>
    tpu.vector_store %arg8[%c0_113, %c0_114, %c0_115], %272 {strides = array<i32>} : memref<8x8x128xf32, #tpu.memory_space<vmem>>, vector<8x8x128xf32>,
    %c1_116 = arith.constant 1 : index
    %c0_117 = arith.constant 0 : index
    %c0_118 = arith.constant 0 : index
    %274 = vector.load %arg3[%c1_116, %c0_117, %c0_118] : memref<2x32x128xf32, #tpu.memory_space<vmem>>, vector<1x32x128xf32>
    %275 = vector.shape_cast %274 : vector<1x32x128xf32> to vector<32x128xf32>
    %cst_119 = arith.constant 0.000000e+00 : f32
    %276 = vector.broadcast %cst_119 : f32 to vector<8x32xf32>
    %cst_120 = arith.constant 0.000000e+00 : f32
    %277 = vector.broadcast %cst_120 : f32 to vector<8x32xf32>
    %c0_i32_121 = arith.constant 0 : i32
    %278 = arith.index_cast %c0_i32_121 : i32 to index
    %c0_122 = arith.constant 0 : index
    %c0_123 = arith.constant 0 : index
    %279 = vector.load %arg8[%278, %c0_122, %c0_123] : memref<8x8x128xf32, #tpu.memory_space<vmem>>, vector<1x8x128xf32>
    %280 = vector.shape_cast %279 : vector<1x8x128xf32> to vector<8x128xf32>
    %cst_124 = arith.constant dense<0.000000e+00> : vector<8x128xf32>
    %281 = tpu.matmul %276, %275, %cst_124 {dimension_numbers = #tpu.dot_dimension_numbers<[1], [0], [0], [1], [0, 0, 1, 1], [], []>} : vector<8x32xf32>, vector<32x128xf32>, vector<8x128xf32> -> vector<8x128xf32>
    %282 = arith.addf %280, %281 : vector<8x128xf32>
    %283 = math.tanh %282 : vector<8x128xf32>
    %284 = vector.extract_strided_slice %283 {offsets = [0, 0], sizes = [8, 32], strides = [1, 1]} : vector<8x128xf32> to vector<8x32xf32>
    %cst_125 = arith.constant 5.000000e-01 : f32
    %285 = vector.broadcast %cst_125 : f32 to vector<8x32xf32>
    %286 = arith.mulf %284, %285 : vector<8x32xf32>
    %cst_126 = arith.constant 5.000000e-01 : f32
    %287 = vector.broadcast %cst_126 : f32 to vector<8x32xf32>
    %288 = arith.addf %286, %287 : vector<8x32xf32>
    %289 = vector.extract_strided_slice %283 {offsets = [0, 32], sizes = [8, 32], strides = [1, 1]} : vector<8x128xf32> to vector<8x32xf32>
    %cst_127 = arith.constant 5.000000e-01 : f32
    %290 = vector.broadcast %cst_127 : f32 to vector<8x32xf32>
    %291 = arith.mulf %289, %290 : vector<8x32xf32>
    %cst_128 = arith.constant 5.000000e-01 : f32
    %292 = vector.broadcast %cst_128 : f32 to vector<8x32xf32>
    %293 = arith.addf %291, %292 : vector<8x32xf32>
    %294 = vector.extract_strided_slice %283 {offsets = [0, 64], sizes = [8, 32], strides = [1, 1]} : vector<8x128xf32> to vector<8x32xf32>
    %295 = vector.extract_strided_slice %283 {offsets = [0, 96], sizes = [8, 32], strides = [1, 1]} : vector<8x128xf32> to vector<8x32xf32>
    %cst_129 = arith.constant 5.000000e-01 : f32
    %296 = vector.broadcast %cst_129 : f32 to vector<8x32xf32>
    %297 = arith.mulf %295, %296 : vector<8x32xf32>
    %cst_130 = arith.constant 5.000000e-01 : f32
    %298 = vector.broadcast %cst_130 : f32 to vector<8x32xf32>
    %299 = arith.addf %297, %298 : vector<8x32xf32>
    %300 = arith.mulf %293, %277 : vector<8x32xf32>
    %301 = arith.mulf %288, %294 : vector<8x32xf32>
    %302 = arith.addf %300, %301 : vector<8x32xf32>
    %303 = math.tanh %302 : vector<8x32xf32>
    %304 = arith.mulf %299, %303 : vector<8x32xf32>
    %c1_i32_131 = arith.constant 1 : i32
    %305 = arith.index_cast %c1_i32_131 : i32 to index
    %c0_132 = arith.constant 0 : index
    %c0_133 = arith.constant 0 : index
    %306 = vector.load %arg8[%305, %c0_132, %c0_133] : memref<8x8x128xf32, #tpu.memory_space<vmem>>, vector<1x8x128xf32>
    %307 = vector.shape_cast %306 : vector<1x8x128xf32> to vector<8x128xf32>
    %cst_134 = arith.constant dense<0.000000e+00> : vector<8x128xf32>
    %308 = tpu.matmul %304, %275, %cst_134 {dimension_numbers = #tpu.dot_dimension_numbers<[1], [0], [0], [1], [0, 0, 1, 1], [], []>} : vector<8x32xf32>, vector<32x128xf32>, vector<8x128xf32> -> vector<8x128xf32>
    %309 = arith.addf %307, %308 : vector<8x128xf32>
    %310 = math.tanh %309 : vector<8x128xf32>
    %311 = vector.extract_strided_slice %310 {offsets = [0, 0], sizes = [8, 32], strides = [1, 1]} : vector<8x128xf32> to vector<8x32xf32>
    %cst_135 = arith.constant 5.000000e-01 : f32
    %312 = vector.broadcast %cst_135 : f32 to vector<8x32xf32>
    %313 = arith.mulf %311, %312 : vector<8x32xf32>
    %cst_136 = arith.constant 5.000000e-01 : f32
    %314 = vector.broadcast %cst_136 : f32 to vector<8x32xf32>
    %315 = arith.addf %313, %314 : vector<8x32xf32>
    %316 = vector.extract_strided_slice %310 {offsets = [0, 32], sizes = [8, 32], strides = [1, 1]} : vector<8x128xf32> to vector<8x32xf32>
    %cst_137 = arith.constant 5.000000e-01 : f32
    %317 = vector.broadcast %cst_137 : f32 to vector<8x32xf32>
    %318 = arith.mulf %316, %317 : vector<8x32xf32>
    %cst_138 = arith.constant 5.000000e-01 : f32
    %319 = vector.broadcast %cst_138 : f32 to vector<8x32xf32>
    %320 = arith.addf %318, %319 : vector<8x32xf32>
    %321 = vector.extract_strided_slice %310 {offsets = [0, 64], sizes = [8, 32], strides = [1, 1]} : vector<8x128xf32> to vector<8x32xf32>
    %322 = vector.extract_strided_slice %310 {offsets = [0, 96], sizes = [8, 32], strides = [1, 1]} : vector<8x128xf32> to vector<8x32xf32>
    %cst_139 = arith.constant 5.000000e-01 : f32
    %323 = vector.broadcast %cst_139 : f32 to vector<8x32xf32>
    %324 = arith.mulf %322, %323 : vector<8x32xf32>
    %cst_140 = arith.constant 5.000000e-01 : f32
    %325 = vector.broadcast %cst_140 : f32 to vector<8x32xf32>
    %326 = arith.addf %324, %325 : vector<8x32xf32>
    %327 = arith.mulf %320, %302 : vector<8x32xf32>
    %328 = arith.mulf %315, %321 : vector<8x32xf32>
    %329 = arith.addf %327, %328 : vector<8x32xf32>
    %330 = math.tanh %329 : vector<8x32xf32>
    %331 = arith.mulf %326, %330 : vector<8x32xf32>
    %c2_i32_141 = arith.constant 2 : i32
    %332 = arith.index_cast %c2_i32_141 : i32 to index
    %c0_142 = arith.constant 0 : index
    %c0_143 = arith.constant 0 : index
    %333 = vector.load %arg8[%332, %c0_142, %c0_143] : memref<8x8x128xf32, #tpu.memory_space<vmem>>, vector<1x8x128xf32>
    %334 = vector.shape_cast %333 : vector<1x8x128xf32> to vector<8x128xf32>
    %cst_144 = arith.constant dense<0.000000e+00> : vector<8x128xf32>
    %335 = tpu.matmul %331, %275, %cst_144 {dimension_numbers = #tpu.dot_dimension_numbers<[1], [0], [0], [1], [0, 0, 1, 1], [], []>} : vector<8x32xf32>, vector<32x128xf32>, vector<8x128xf32> -> vector<8x128xf32>
    %336 = arith.addf %334, %335 : vector<8x128xf32>
    %337 = math.tanh %336 : vector<8x128xf32>
    %338 = vector.extract_strided_slice %337 {offsets = [0, 0], sizes = [8, 32], strides = [1, 1]} : vector<8x128xf32> to vector<8x32xf32>
    %cst_145 = arith.constant 5.000000e-01 : f32
    %339 = vector.broadcast %cst_145 : f32 to vector<8x32xf32>
    %340 = arith.mulf %338, %339 : vector<8x32xf32>
    %cst_146 = arith.constant 5.000000e-01 : f32
    %341 = vector.broadcast %cst_146 : f32 to vector<8x32xf32>
    %342 = arith.addf %340, %341 : vector<8x32xf32>
    %343 = vector.extract_strided_slice %337 {offsets = [0, 32], sizes = [8, 32], strides = [1, 1]} : vector<8x128xf32> to vector<8x32xf32>
    %cst_147 = arith.constant 5.000000e-01 : f32
    %344 = vector.broadcast %cst_147 : f32 to vector<8x32xf32>
    %345 = arith.mulf %343, %344 : vector<8x32xf32>
    %cst_148 = arith.constant 5.000000e-01 : f32
    %346 = vector.broadcast %cst_148 : f32 to vector<8x32xf32>
    %347 = arith.addf %345, %346 : vector<8x32xf32>
    %348 = vector.extract_strided_slice %337 {offsets = [0, 64], sizes = [8, 32], strides = [1, 1]} : vector<8x128xf32> to vector<8x32xf32>
    %349 = vector.extract_strided_slice %337 {offsets = [0, 96], sizes = [8, 32], strides = [1, 1]} : vector<8x128xf32> to vector<8x32xf32>
    %cst_149 = arith.constant 5.000000e-01 : f32
    %350 = vector.broadcast %cst_149 : f32 to vector<8x32xf32>
    %351 = arith.mulf %349, %350 : vector<8x32xf32>
    %cst_150 = arith.constant 5.000000e-01 : f32
    %352 = vector.broadcast %cst_150 : f32 to vector<8x32xf32>
    %353 = arith.addf %351, %352 : vector<8x32xf32>
    %354 = arith.mulf %347, %329 : vector<8x32xf32>
    %355 = arith.mulf %342, %348 : vector<8x32xf32>
    %356 = arith.addf %354, %355 : vector<8x32xf32>
    %357 = math.tanh %356 : vector<8x32xf32>
    %358 = arith.mulf %353, %357 : vector<8x32xf32>
    %c3_i32_151 = arith.constant 3 : i32
    %359 = arith.index_cast %c3_i32_151 : i32 to index
    %c0_152 = arith.constant 0 : index
    %c0_153 = arith.constant 0 : index
    %360 = vector.load %arg8[%359, %c0_152, %c0_153] : memref<8x8x128xf32, #tpu.memory_space<vmem>>, vector<1x8x128xf32>
    %361 = vector.shape_cast %360 : vector<1x8x128xf32> to vector<8x128xf32>
    %cst_154 = arith.constant dense<0.000000e+00> : vector<8x128xf32>
    %362 = tpu.matmul %358, %275, %cst_154 {dimension_numbers = #tpu.dot_dimension_numbers<[1], [0], [0], [1], [0, 0, 1, 1], [], []>} : vector<8x32xf32>, vector<32x128xf32>, vector<8x128xf32> -> vector<8x128xf32>
    %363 = arith.addf %361, %362 : vector<8x128xf32>
    %364 = math.tanh %363 : vector<8x128xf32>
    %365 = vector.extract_strided_slice %364 {offsets = [0, 0], sizes = [8, 32], strides = [1, 1]} : vector<8x128xf32> to vector<8x32xf32>
    %cst_155 = arith.constant 5.000000e-01 : f32
    %366 = vector.broadcast %cst_155 : f32 to vector<8x32xf32>
    %367 = arith.mulf %365, %366 : vector<8x32xf32>
    %cst_156 = arith.constant 5.000000e-01 : f32
    %368 = vector.broadcast %cst_156 : f32 to vector<8x32xf32>
    %369 = arith.addf %367, %368 : vector<8x32xf32>
    %370 = vector.extract_strided_slice %364 {offsets = [0, 32], sizes = [8, 32], strides = [1, 1]} : vector<8x128xf32> to vector<8x32xf32>
    %cst_157 = arith.constant 5.000000e-01 : f32
    %371 = vector.broadcast %cst_157 : f32 to vector<8x32xf32>
    %372 = arith.mulf %370, %371 : vector<8x32xf32>
    %cst_158 = arith.constant 5.000000e-01 : f32
    %373 = vector.broadcast %cst_158 : f32 to vector<8x32xf32>
    %374 = arith.addf %372, %373 : vector<8x32xf32>
    %375 = vector.extract_strided_slice %364 {offsets = [0, 64], sizes = [8, 32], strides = [1, 1]} : vector<8x128xf32> to vector<8x32xf32>
    %376 = vector.extract_strided_slice %364 {offsets = [0, 96], sizes = [8, 32], strides = [1, 1]} : vector<8x128xf32> to vector<8x32xf32>
    %cst_159 = arith.constant 5.000000e-01 : f32
    %377 = vector.broadcast %cst_159 : f32 to vector<8x32xf32>
    %378 = arith.mulf %376, %377 : vector<8x32xf32>
    %cst_160 = arith.constant 5.000000e-01 : f32
    %379 = vector.broadcast %cst_160 : f32 to vector<8x32xf32>
    %380 = arith.addf %378, %379 : vector<8x32xf32>
    %381 = arith.mulf %374, %356 : vector<8x32xf32>
    %382 = arith.mulf %369, %375 : vector<8x32xf32>
    %383 = arith.addf %381, %382 : vector<8x32xf32>
    %384 = math.tanh %383 : vector<8x32xf32>
    %385 = arith.mulf %380, %384 : vector<8x32xf32>
    %c4_i32_161 = arith.constant 4 : i32
    %386 = arith.index_cast %c4_i32_161 : i32 to index
    %c0_162 = arith.constant 0 : index
    %c0_163 = arith.constant 0 : index
    %387 = vector.load %arg8[%386, %c0_162, %c0_163] : memref<8x8x128xf32, #tpu.memory_space<vmem>>, vector<1x8x128xf32>
    %388 = vector.shape_cast %387 : vector<1x8x128xf32> to vector<8x128xf32>
    %cst_164 = arith.constant dense<0.000000e+00> : vector<8x128xf32>
    %389 = tpu.matmul %385, %275, %cst_164 {dimension_numbers = #tpu.dot_dimension_numbers<[1], [0], [0], [1], [0, 0, 1, 1], [], []>} : vector<8x32xf32>, vector<32x128xf32>, vector<8x128xf32> -> vector<8x128xf32>
    %390 = arith.addf %388, %389 : vector<8x128xf32>
    %391 = math.tanh %390 : vector<8x128xf32>
    %392 = vector.extract_strided_slice %391 {offsets = [0, 0], sizes = [8, 32], strides = [1, 1]} : vector<8x128xf32> to vector<8x32xf32>
    %cst_165 = arith.constant 5.000000e-01 : f32
    %393 = vector.broadcast %cst_165 : f32 to vector<8x32xf32>
    %394 = arith.mulf %392, %393 : vector<8x32xf32>
    %cst_166 = arith.constant 5.000000e-01 : f32
    %395 = vector.broadcast %cst_166 : f32 to vector<8x32xf32>
    %396 = arith.addf %394, %395 : vector<8x32xf32>
    %397 = vector.extract_strided_slice %391 {offsets = [0, 32], sizes = [8, 32], strides = [1, 1]} : vector<8x128xf32> to vector<8x32xf32>
    %cst_167 = arith.constant 5.000000e-01 : f32
    %398 = vector.broadcast %cst_167 : f32 to vector<8x32xf32>
    %399 = arith.mulf %397, %398 : vector<8x32xf32>
    %cst_168 = arith.constant 5.000000e-01 : f32
    %400 = vector.broadcast %cst_168 : f32 to vector<8x32xf32>
    %401 = arith.addf %399, %400 : vector<8x32xf32>
    %402 = vector.extract_strided_slice %391 {offsets = [0, 64], sizes = [8, 32], strides = [1, 1]} : vector<8x128xf32> to vector<8x32xf32>
    %403 = vector.extract_strided_slice %391 {offsets = [0, 96], sizes = [8, 32], strides = [1, 1]} : vector<8x128xf32> to vector<8x32xf32>
    %cst_169 = arith.constant 5.000000e-01 : f32
    %404 = vector.broadcast %cst_169 : f32 to vector<8x32xf32>
    %405 = arith.mulf %403, %404 : vector<8x32xf32>
    %cst_170 = arith.constant 5.000000e-01 : f32
    %406 = vector.broadcast %cst_170 : f32 to vector<8x32xf32>
    %407 = arith.addf %405, %406 : vector<8x32xf32>
    %408 = arith.mulf %401, %383 : vector<8x32xf32>
    %409 = arith.mulf %396, %402 : vector<8x32xf32>
    %410 = arith.addf %408, %409 : vector<8x32xf32>
    %411 = math.tanh %410 : vector<8x32xf32>
    %412 = arith.mulf %407, %411 : vector<8x32xf32>
    %c5_i32_171 = arith.constant 5 : i32
    %413 = arith.index_cast %c5_i32_171 : i32 to index
    %c0_172 = arith.constant 0 : index
    %c0_173 = arith.constant 0 : index
    %414 = vector.load %arg8[%413, %c0_172, %c0_173] : memref<8x8x128xf32, #tpu.memory_space<vmem>>, vector<1x8x128xf32>
    %415 = vector.shape_cast %414 : vector<1x8x128xf32> to vector<8x128xf32>
    %cst_174 = arith.constant dense<0.000000e+00> : vector<8x128xf32>
    %416 = tpu.matmul %412, %275, %cst_174 {dimension_numbers = #tpu.dot_dimension_numbers<[1], [0], [0], [1], [0, 0, 1, 1], [], []>} : vector<8x32xf32>, vector<32x128xf32>, vector<8x128xf32> -> vector<8x128xf32>
    %417 = arith.addf %415, %416 : vector<8x128xf32>
    %418 = math.tanh %417 : vector<8x128xf32>
    %419 = vector.extract_strided_slice %418 {offsets = [0, 0], sizes = [8, 32], strides = [1, 1]} : vector<8x128xf32> to vector<8x32xf32>
    %cst_175 = arith.constant 5.000000e-01 : f32
    %420 = vector.broadcast %cst_175 : f32 to vector<8x32xf32>
    %421 = arith.mulf %419, %420 : vector<8x32xf32>
    %cst_176 = arith.constant 5.000000e-01 : f32
    %422 = vector.broadcast %cst_176 : f32 to vector<8x32xf32>
    %423 = arith.addf %421, %422 : vector<8x32xf32>
    %424 = vector.extract_strided_slice %418 {offsets = [0, 32], sizes = [8, 32], strides = [1, 1]} : vector<8x128xf32> to vector<8x32xf32>
    %cst_177 = arith.constant 5.000000e-01 : f32
    %425 = vector.broadcast %cst_177 : f32 to vector<8x32xf32>
    %426 = arith.mulf %424, %425 : vector<8x32xf32>
    %cst_178 = arith.constant 5.000000e-01 : f32
    %427 = vector.broadcast %cst_178 : f32 to vector<8x32xf32>
    %428 = arith.addf %426, %427 : vector<8x32xf32>
    %429 = vector.extract_strided_slice %418 {offsets = [0, 64], sizes = [8, 32], strides = [1, 1]} : vector<8x128xf32> to vector<8x32xf32>
    %430 = vector.extract_strided_slice %418 {offsets = [0, 96], sizes = [8, 32], strides = [1, 1]} : vector<8x128xf32> to vector<8x32xf32>
    %cst_179 = arith.constant 5.000000e-01 : f32
    %431 = vector.broadcast %cst_179 : f32 to vector<8x32xf32>
    %432 = arith.mulf %430, %431 : vector<8x32xf32>
    %cst_180 = arith.constant 5.000000e-01 : f32
    %433 = vector.broadcast %cst_180 : f32 to vector<8x32xf32>
    %434 = arith.addf %432, %433 : vector<8x32xf32>
    %435 = arith.mulf %428, %410 : vector<8x32xf32>
    %436 = arith.mulf %423, %429 : vector<8x32xf32>
    %437 = arith.addf %435, %436 : vector<8x32xf32>
    %438 = math.tanh %437 : vector<8x32xf32>
    %439 = arith.mulf %434, %438 : vector<8x32xf32>
    %c6_i32_181 = arith.constant 6 : i32
    %440 = arith.index_cast %c6_i32_181 : i32 to index
    %c0_182 = arith.constant 0 : index
    %c0_183 = arith.constant 0 : index
    %441 = vector.load %arg8[%440, %c0_182, %c0_183] : memref<8x8x128xf32, #tpu.memory_space<vmem>>, vector<1x8x128xf32>
    %442 = vector.shape_cast %441 : vector<1x8x128xf32> to vector<8x128xf32>
    %cst_184 = arith.constant dense<0.000000e+00> : vector<8x128xf32>
    %443 = tpu.matmul %439, %275, %cst_184 {dimension_numbers = #tpu.dot_dimension_numbers<[1], [0], [0], [1], [0, 0, 1, 1], [], []>} : vector<8x32xf32>, vector<32x128xf32>, vector<8x128xf32> -> vector<8x128xf32>
    %444 = arith.addf %442, %443 : vector<8x128xf32>
    %445 = math.tanh %444 : vector<8x128xf32>
    %446 = vector.extract_strided_slice %445 {offsets = [0, 0], sizes = [8, 32], strides = [1, 1]} : vector<8x128xf32> to vector<8x32xf32>
    %cst_185 = arith.constant 5.000000e-01 : f32
    %447 = vector.broadcast %cst_185 : f32 to vector<8x32xf32>
    %448 = arith.mulf %446, %447 : vector<8x32xf32>
    %cst_186 = arith.constant 5.000000e-01 : f32
    %449 = vector.broadcast %cst_186 : f32 to vector<8x32xf32>
    %450 = arith.addf %448, %449 : vector<8x32xf32>
    %451 = vector.extract_strided_slice %445 {offsets = [0, 32], sizes = [8, 32], strides = [1, 1]} : vector<8x128xf32> to vector<8x32xf32>
    %cst_187 = arith.constant 5.000000e-01 : f32
    %452 = vector.broadcast %cst_187 : f32 to vector<8x32xf32>
    %453 = arith.mulf %451, %452 : vector<8x32xf32>
    %cst_188 = arith.constant 5.000000e-01 : f32
    %454 = vector.broadcast %cst_188 : f32 to vector<8x32xf32>
    %455 = arith.addf %453, %454 : vector<8x32xf32>
    %456 = vector.extract_strided_slice %445 {offsets = [0, 64], sizes = [8, 32], strides = [1, 1]} : vector<8x128xf32> to vector<8x32xf32>
    %457 = vector.extract_strided_slice %445 {offsets = [0, 96], sizes = [8, 32], strides = [1, 1]} : vector<8x128xf32> to vector<8x32xf32>
    %cst_189 = arith.constant 5.000000e-01 : f32
    %458 = vector.broadcast %cst_189 : f32 to vector<8x32xf32>
    %459 = arith.mulf %457, %458 : vector<8x32xf32>
    %cst_190 = arith.constant 5.000000e-01 : f32
    %460 = vector.broadcast %cst_190 : f32 to vector<8x32xf32>
    %461 = arith.addf %459, %460 : vector<8x32xf32>
    %462 = arith.mulf %455, %437 : vector<8x32xf32>
    %463 = arith.mulf %450, %456 : vector<8x32xf32>
    %464 = arith.addf %462, %463 : vector<8x32xf32>
    %465 = math.tanh %464 : vector<8x32xf32>
    %466 = arith.mulf %461, %465 : vector<8x32xf32>
    %c7_i32_191 = arith.constant 7 : i32
    %467 = arith.index_cast %c7_i32_191 : i32 to index
    %c0_192 = arith.constant 0 : index
    %c0_193 = arith.constant 0 : index
    %468 = vector.load %arg8[%467, %c0_192, %c0_193] : memref<8x8x128xf32, #tpu.memory_space<vmem>>, vector<1x8x128xf32>
    %469 = vector.shape_cast %468 : vector<1x8x128xf32> to vector<8x128xf32>
    %cst_194 = arith.constant dense<0.000000e+00> : vector<8x128xf32>
    %470 = tpu.matmul %466, %275, %cst_194 {dimension_numbers = #tpu.dot_dimension_numbers<[1], [0], [0], [1], [0, 0, 1, 1], [], []>} : vector<8x32xf32>, vector<32x128xf32>, vector<8x128xf32> -> vector<8x128xf32>
    %471 = arith.addf %469, %470 : vector<8x128xf32>
    %472 = math.tanh %471 : vector<8x128xf32>
    %473 = vector.extract_strided_slice %472 {offsets = [0, 0], sizes = [8, 32], strides = [1, 1]} : vector<8x128xf32> to vector<8x32xf32>
    %cst_195 = arith.constant 5.000000e-01 : f32
    %474 = vector.broadcast %cst_195 : f32 to vector<8x32xf32>
    %475 = arith.mulf %473, %474 : vector<8x32xf32>
    %cst_196 = arith.constant 5.000000e-01 : f32
    %476 = vector.broadcast %cst_196 : f32 to vector<8x32xf32>
    %477 = arith.addf %475, %476 : vector<8x32xf32>
    %478 = vector.extract_strided_slice %472 {offsets = [0, 32], sizes = [8, 32], strides = [1, 1]} : vector<8x128xf32> to vector<8x32xf32>
    %cst_197 = arith.constant 5.000000e-01 : f32
    %479 = vector.broadcast %cst_197 : f32 to vector<8x32xf32>
    %480 = arith.mulf %478, %479 : vector<8x32xf32>
    %cst_198 = arith.constant 5.000000e-01 : f32
    %481 = vector.broadcast %cst_198 : f32 to vector<8x32xf32>
    %482 = arith.addf %480, %481 : vector<8x32xf32>
    %483 = vector.extract_strided_slice %472 {offsets = [0, 64], sizes = [8, 32], strides = [1, 1]} : vector<8x128xf32> to vector<8x32xf32>
    %484 = vector.extract_strided_slice %472 {offsets = [0, 96], sizes = [8, 32], strides = [1, 1]} : vector<8x128xf32> to vector<8x32xf32>
    %cst_199 = arith.constant 5.000000e-01 : f32
    %485 = vector.broadcast %cst_199 : f32 to vector<8x32xf32>
    %486 = arith.mulf %484, %485 : vector<8x32xf32>
    %cst_200 = arith.constant 5.000000e-01 : f32
    %487 = vector.broadcast %cst_200 : f32 to vector<8x32xf32>
    %488 = arith.addf %486, %487 : vector<8x32xf32>
    %489 = arith.mulf %482, %464 : vector<8x32xf32>
    %490 = arith.mulf %477, %483 : vector<8x32xf32>
    %491 = arith.addf %489, %490 : vector<8x32xf32>
    %492 = math.tanh %491 : vector<8x32xf32>
    %493 = arith.mulf %488, %492 : vector<8x32xf32>
    %c8_i32_201 = arith.constant 8 : i32
    %c0_202 = arith.constant 0 : index
    %c0_203 = arith.constant 0 : index
    %494 = vector.load %arg5[%c0_202, %c0_203] : memref<32x128xf32, #tpu.memory_space<vmem>>, vector<32x128xf32>
    %cst_204 = arith.constant dense<0.000000e+00> : vector<8x128xf32>
    %495 = tpu.matmul %493, %494, %cst_204 {dimension_numbers = #tpu.dot_dimension_numbers<[1], [0], [0], [1], [0, 0, 1, 1], [], []>} : vector<8x32xf32>, vector<32x128xf32>, vector<8x128xf32> -> vector<8x128xf32>
    %c0_205 = arith.constant 0 : index
    %c0_206 = arith.constant 0 : index
    %496 = vector.load %arg6[%c0_205, %c0_206] : memref<1x128xf32, #tpu.memory_space<vmem>>, vector<1x128xf32>
    %497 = vector.broadcast %496 : vector<1x128xf32> to vector<8x128xf32>
    %498 = arith.addf %495, %497 : vector<8x128xf32>
    %c0_207 = arith.constant 0 : index
    %c0_208 = arith.constant 0 : index
    %499 = vector.load %arg7[%c0_207, %c0_208] : memref<8x128xf32, #tpu.memory_space<vmem>>, vector<8x128xf32>
    tpu.vector_store %arg7[%c0_207, %c0_208], %498 {strides = array<i32>} : memref<8x128xf32, #tpu.memory_space<vmem>>, vector<8x128xf32>,
    return
  }
  func.func @transform_0(%arg0: i32) -> (i32, i32, i32) {
    %c0_i32 = arith.constant 0 : i32
    %c0_i32_0 = arith.constant 0 : i32
    %c0_i32_1 = arith.constant 0 : i32
    %c0_i32_2 = arith.constant 0 : i32
    return %c0_i32, %c0_i32_0, %c0_i32_1 : i32, i32, i32
  }
  func.func @transform_1(%arg0: i32) -> (i32, i32, i32) {
    %c0_i32 = arith.constant 0 : i32
    %c0_i32_0 = arith.constant 0 : i32
    %c0_i32_1 = arith.constant 0 : i32
    %c0_i32_2 = arith.constant 0 : i32
    return %c0_i32, %c0_i32_0, %c0_i32_1 : i32, i32, i32
  }
  func.func @transform_2(%arg0: i32) -> (i32, i32, i32) {
    %c0_i32 = arith.constant 0 : i32
    %c0_i32_0 = arith.constant 0 : i32
    %c0_i32_1 = arith.constant 0 : i32
    %c0_i32_2 = arith.constant 0 : i32
    return %c0_i32, %c0_i32_0, %c0_i32_1 : i32, i32, i32
  }
  func.func @transform_3(%arg0: i32) -> (i32, i32, i32) {
    %c0_i32 = arith.constant 0 : i32
    %c0_i32_0 = arith.constant 0 : i32
    %c0_i32_1 = arith.constant 0 : i32
    %c0_i32_2 = arith.constant 0 : i32
    return %c0_i32, %c0_i32_0, %c0_i32_1 : i32, i32, i32
  }
  func.func @transform_4(%arg0: i32) -> (i32, i32) {
    %c0_i32 = arith.constant 0 : i32
    %c0_i32_0 = arith.constant 0 : i32
    %c0_i32_1 = arith.constant 0 : i32
    return %c0_i32, %c0_i32_0 : i32, i32
  }
  func.func @transform_5(%arg0: i32) -> (i32, i32) {
    %c0_i32 = arith.constant 0 : i32
    %c0_i32_0 = arith.constant 0 : i32
    %c0_i32_1 = arith.constant 0 : i32
    return %c0_i32, %c0_i32_0 : i32, i32
  }
  func.func @transform_6(%arg0: i32) -> (i32, i32) {
    %c0_i32 = arith.constant 0 : i32
    %c0_i32_0 = arith.constant 0 : i32
    %c0_i32_1 = arith.constant 0 : i32
    return %c0_i32, %c0_i32_0 : i32, i32
  }
}

</mosaic_0001>

<bundles_post_ra>
// kernel: rnn_forward.1
= control target key start
LH: loop header
LB: loop body
LE: loop exit
PB: predicated region body
PF: predicated region fallthrough
CT: control target
= control target key end

     0   :  { %v2622_v3 = vmov 0.0|0.0   ;;  %vm2623_vm0 = vmmov 0   ;;  %v2624_v4 = vmov 0.0   ;;  %s2625_s19 = smov 64   ;;  %s2626_s20 = smov 32   ;;  %vm172_vm1 = vcmask 261120   ;;  %s3047_s1 = inlined_call_operand.vmem [shape: f32[2,128,128], index: 1, kind: input, shape index: {}]   ;;  %s3048_s2 = inlined_call_operand.vmem [shape: f32[2,32,128], index: 2, kind: input, shape index: {}]   ;;  %s3049_s0 = inlined_call_operand.vmem [shape: f32[8,8,128], index: 0, kind: input, shape index: {}]   ;;  %s3050_s3 = inlined_call_operand.vmem [shape: f32[2,1,128], index: 3, kind: input, shape index: {}]   ;;  %s3051_s4 = inlined_call_operand.vmem [shape: f32[32,128], index: 4, kind: input, shape index: {}]   ;;  %s3052_s5 = inlined_call_operand.vmem [shape: f32[1,128], index: 5, kind: input, shape index: {}]   ;;  %s3053_s6 = inlined_call_operand.vmem [shape: f32[8,128], index: 6, kind: output, shape index: {}]  }
   0x1   :  { %v31_v0 = vld [vmem:[%s3047_s1] sm:$0xff]  ;;  %v32_v1 = vld [vmem:[%s3047_s1 + $0x8] sm:$0xff]  ;;  %v33_v2 = vld [vmem:[%s3047_s1 + $0x10] sm:$0xff]  ;;  %2443 = vmatprep.subr.bf16.mxu1 %v2622_v3  ;;  %2212 = vmatprep.mubr.msk.f32.mxu1 %vm2623_vm0, %v2624_v4 }
   0x2   :  { %v2411_v5 = vpack.c.bf16 %v32_v1, %v31_v0  ;;  %v34_v6 = vld [vmem:[%s3047_s1 + $0x18] sm:$0xff]  ;;  %v35_v8 = vld [vmem:[%s3047_s1 + $0x20] sm:$0xff]  ;;  %v36_v9 = vld [vmem:[%s3047_s1 + $0x28] sm:$0xff] }
   0x3   :  { %v2415_v7 = vpack.c.bf16 %v34_v6, %v33_v2  ;;  %v167_v10 = vld [vmem:[%s3048_s2] sm:$0xff]  ;;  %v2419_v11 = vpack.c.bf16 %v36_v9, %v35_v8  ;;  %v37_v12 = vld [vmem:[%s3047_s1 + $0x30] sm:$0xff]  ;;  %v38_v13 = vld [vmem:[%s3047_s1 + $0x38] sm:$0xff] }
   0x4   :  { %2412 = vmatprep.subr.bf16.mxu0 %v2411_v5  ;;  %v168_v14 = vld [vmem:[%s3048_s2 + $0x8] sm:$0xff]  ;;  %v23_v16 = vld [vmem:[%s3049_s0] sm:$0xff]  ;;  %v169_v17 = vld [vmem:[%s3048_s2 + $0x10] sm:$0xff]  ;;  %v2423_v20 = vpack.c.bf16 %v38_v13, %v37_v12 }
   0x5   :  { %2414 = vmatpush3.bf16.msra.mxu0 %v2411_v5  ;;  %v2695_v15 = vpack.c.bf16 %v168_v14, %v167_v10  ;;  %v170_v18 = vld [vmem:[%s3048_s2 + $0x18] sm:$0xff]  ;;  %2192 = vmatprep.mubr.f32.mxu0 %v23_v16  ;;  %v39_v21 = vld [vmem:[%s3047_s1 + $0x40] sm:$0xff]  ;;  %v40_v22 = vld [vmem:[%s3047_s1 + $0x48] sm:$0xff] }
   0x6   :  { %2416 = vmatprep.subr.bf16.mxu0 %v2415_v7  ;;  %v2707_v19 = vpack.c.bf16 %v170_v18, %v169_v17  ;;  %v2427_v23 = vpack.c.bf16 %v40_v22, %v39_v21  ;;  %v41_v24 = vld [vmem:[%s3047_s1 + $0x50] sm:$0xff]  ;;  %v42_v25 = vld [vmem:[%s3047_s1 + $0x58] sm:$0xff]  ;;  %v43_v27 = vld [vmem:[%s3047_s1 + $0x60] sm:$0xff] }
   0x7   :  { %2445 = vmatpush3.bf16.msra.mxu1 %v2695_v15  ;;  %v2431_v26 = vpack.c.bf16 %v42_v25, %v41_v24  ;;  %v44_v28 = vld [vmem:[%s3047_s1 + $0x68] sm:$0xff]  ;;  %v45_v30 = vld [vmem:[%s3047_s1 + $0x70] sm:$0xff]  ;;  %v46_v31 = vld [vmem:[%s3047_s1 + $0x78] sm:$0xff] }
   0x8   :  { %2446 = vmatprep.subr.bf16.mxu1 %v2622_v3  ;;  %v2435_v29 = vpack.c.bf16 %v44_v28, %v43_v27  ;;  %v2439_v32 = vpack.c.bf16 %v46_v31, %v45_v30  ;;  %v24_v33 = vld [vmem:[%s3049_s0 + $0x8] sm:$0xff]  ;;  %v2754_v36 = vld [vmem:[%s3050_s3] ss:$0 sm:$0xff]  ;;  %v25_v1 = vld [vmem:[%s3049_s0 + $0x10] sm:$0xff] }
   0x9   :  { %2418 = vmatpush3.bf16.msra.mxu0 %v2415_v7  ;;  %v26_v2 = vld [vmem:[%s3049_s0 + $0x18] sm:$0xff] }
   0xa   :  { %2420 = vmatprep.subr.bf16.mxu0 %v2419_v11 }
   0xb   :  { %2448 = vmatpush3.bf16.msra.mxu1 %v2707_v19 }
   0xc   :  { %2449 = vmatprep.subr.bf16.mxu1 %v2622_v3 }
   0xd   :  { %2422 = vmatpush3.bf16.msra.mxu0 %v2419_v11 }
   0xe   :  { %2424 = vmatprep.subr.bf16.mxu0 %v2423_v20  ;;  %2213 = vmatmul.mubr.f32.vlgmr.msra.gmra.mrb[0].mxu1 %v2624_v4 }
   0xf   :  { %2451 = vmatpush3.bf16.msra.mxu1 %v2695_v15  ;;  %2223 = vmatprep.mubr.msk.f32.mxu1 %vm2623_vm0, %v2624_v4 }
  0x10   :  { %2452 = vmatprep.subr.bf16.mxu1 %v2622_v3 }
  0x11   :  { %2426 = vmatpush3.bf16.msra.mxu0 %v2423_v20 }
  0x12   :  { %2428 = vmatprep.subr.bf16.mxu0 %v2427_v23 }
  0x13   :  { %2454 = vmatpush3.bf16.msra.mxu1 %v2707_v19 }
  0x14   :  { %2455 = vmatprep.subr.bf16.mxu1 %v2622_v3 }
  0x15   :  { %2430 = vmatpush3.bf16.msra.mxu0 %v2427_v23 }
  0x16   :  { %2432 = vmatprep.subr.bf16.mxu0 %v2431_v26 }
  0x19   :  { %2434 = vmatpush3.bf16.msra.mxu0 %v2431_v26 }
  0x1a   :  { %2436 = vmatprep.subr.bf16.mxu0 %v2435_v29 }
  0x1d   :  { %2438 = vmatpush3.bf16.msra.mxu0 %v2435_v29 }
  0x1e   :  { %2440 = vmatprep.subr.bf16.mxu0 %v2439_v32 }
  0x21   :  { %2442 = vmatpush3.bf16.msra.mxu0 %v2439_v32 }
  0x22   :  { %2473 = vmatprep.subr.bf16.mxu0 %v2622_v3 }
  0x24   :  { %2193 = vmatmul.mubr.f32.vlgmr.msra.gmra.mrb[0].mxu0 %v24_v33 }
  0x25   :  { %2475 = vmatpush3.bf16.msra.mxu0 %v2695_v15  ;;  %2195 = vmatprep.mubr.f32.mxu0 %v25_v1 }
  0x26   :  { %2476 = vmatprep.subr.bf16.mxu0 %v2622_v3 }
  0x28   :  { %2196 = vmatmul.mubr.f32.gmra.mrb[2].mxu0 %v26_v2 }
  0x29   :  { %2478 = vmatpush3.bf16.msra.mxu0 %v2707_v19 }
  0x2a   :  { %2485 = vmatprep.subr.bf16.mxu0 %v2622_v3 }
  0xe1   :  { %v242_v34 = vpop.f32.mrb[0].mxu1 }
  0xe2   :  { %v2214_v35 = vpop.f32.mrb[1].mxu1 }
  0xf7   :  { %v2194_v37 = vpop.f32.mrb[0].mxu0 }
  0xf8   :  { %v120_v38 = vpop.f32.mrb[1].mxu0  ;;  %v126_v53 = vadd.f32 %v2194_v37, %v2754_v36 }
  0xf9   :  { %v121_v39 = vadd.f32 %v2754_v36, %v120_v38 }
  0xfb   :  { %v246_v40 = vadd.f32 %v242_v34, %v121_v39  ;;  %v2197_v8 = vpop.f32.mrb[2].mxu0 }
  0xfc   :  { %v130_v9 = vpop.f32.mrb[3].mxu0  ;;  %v136_v29 = vadd.f32 %v2197_v8, %v2754_v36 }
  0xfd   :  { %2558 = vtanh.f32 %v246_v40  ;;  %v131_v11 = vadd.f32 %v2754_v36, %v130_v9 }
 0x107   :  { %v2559_v41 = vpop.eup %2558 }
 0x108   :  { %252 = vrot.lane.b32.xlu0 %v2559_v41, %s2625_s19  ;;  %v248_v42 = vmul.f32 0.5, %v2559_v41 }
 0x10a   :  { %v249_v43 = vadd.f32 0.5, %v248_v42  ;;  %v27_v42 = vld [vmem:[%s3049_s0 + $0x20] sm:$0xff] }
 0x10b   :  { %2198 = vmatprep.mubr.f32.mxu0 %v27_v42 }
 0x10c   :  { %v250_v46 = vmul.f32 0.0, %v249_v43 }
 0x17a   :  { %v253_v44 = vpop.permute.xlu0 %252 }
 0x17b   :  { %v255_v45 = vmul.f32 %v253_v44, %v249_v43 }
 0x17d   :  { %257 = vrot.lane.b32.xlu0 %v255_v45, %s2626_s20 }
 0x1ef   :  { %v258_v47 = vpop.permute.xlu0 %257 }
 0x1f0   :  { %v260_v48 = vadd.f32 %v258_v47, %v250_v46 }
 0x1f2   :  { %2560 = vtanh.f32 %v260_v48 }
 0x1fc   :  { %v2561_v49 = vpop.eup %2560 }
 0x1fd   :  { %263 = vrot.lane.b32.xlu1 %v2561_v49, %s2625_s19 }
 0x26f   :  { %v264_v50 = vpop.permute.xlu1 %263 }
 0x270   :  { %v266_v51 = vmul.f32 %v264_v50, %v249_v43  ;;  %v28_v43 = vld [vmem:[%s3049_s0 + $0x28] sm:$0xff] }
 0x271   :  { %2199 = vmatmul.mubr.f32.gmra.mrb[4].mxu0 %v28_v43 }
 0x272   :  { %268 = vrot.lane.b32.xlu1 %v266_v51, %s2626_s20 }
 0x2e4   :  { %v269_v52 = vpop.permute.xlu1 %268 }
 0x2e5   :  { %271 = vst.msk [vmem:[#allocation3] sm:$0xff] %vm172_vm1, %v269_v52  ;;  %2224 = vmatmul.mubr.msk.f32.vlgmr.msra.gmra.mrb[2].mxu1 %vm172_vm1, %v269_v52 }
 0x2e6   :  { %2457 = vmatpush3.bf16.msra.mxu1 %v2695_v15  ;;  %2234 = vmatprep.mubr.msk.f32.mxu1 %vm2623_vm0, %v2624_v4 }
 0x2e7   :  { %2458 = vmatprep.subr.bf16.mxu1 %v2622_v3 }
 0x2ea   :  { %2460 = vmatpush3.bf16.msra.mxu1 %v2707_v19 }
 0x2eb   :  { %2461 = vmatprep.subr.bf16.mxu1 %v2622_v3 }
 0x344   :  { %v2200_v47 = vpop.f32.mrb[4].mxu0 }
 0x345   :  { %v146_v8 = vadd.f32 %v2200_v47, %v2754_v36 }
 0x3b8   :  { %v342_v54 = vpop.f32.mrb[2].mxu1 }
 0x3b9   :  { %v346_v55 = vadd.f32 %v342_v54, %v126_v53  ;;  %v2225_v56 = vpop.f32.mrb[3].mxu1 }
 0x3bb   :  { %2562 = vtanh.f32 %v346_v55 }
 0x3c5   :  { %v2563_v57 = vpop.eup %2562 }
 0x3c6   :  { %352 = vrot.lane.b32.xlu0 %v2563_v57, %s2625_s19  ;;  %v348_v58 = vmul.f32 0.5, %v2563_v57 }
 0x3c8   :  { %v349_v59 = vadd.f32 0.5, %v348_v58 }
 0x3ca   :  { %v350_v62 = vmul.f32 %v349_v59, %v260_v48  ;;  %v140_v48 = vpop.f32.mrb[5].mxu0 }
 0x3cb   :  { %v141_v50 = vadd.f32 %v2754_v36, %v140_v48 }
 0x438   :  { %v353_v60 = vpop.permute.xlu0 %352 }
 0x439   :  { %v355_v61 = vmul.f32 %v353_v60, %v349_v59 }
 0x43b   :  { %357 = vrot.lane.b32.xlu1 %v355_v61, %s2626_s20 }
 0x4ad   :  { %v358_v63 = vpop.permute.xlu1 %357 }
 0x4ae   :  { %v360_v0 = vadd.f32 %v358_v63, %v350_v62  ;;  %v29_v62 = vld [vmem:[%s3049_s0 + $0x30] sm:$0xff]  ;;  %v30_v63 = vld [vmem:[%s3049_s0 + $0x38] sm:$0xff] }
 0x4af   :  { %2201 = vmatprep.mubr.f32.mxu0 %v29_v62 }
 0x4b0   :  { %2564 = vtanh.f32 %v360_v0  ;;  %2202 = vmatmul.mubr.f32.gmra.mrb[6].mxu0 %v30_v63 }
 0x4b1   :  { %2267 = vmatprep.mubr.msk.f32.mxu0 %vm2623_vm0, %v2624_v4 }
 0x4ba   :  { %v2565_v5 = vpop.eup %2564 }
 0x4bb   :  { %363 = vrot.lane.b32.xlu0 %v2565_v5, %s2625_s19 }
 0x52d   :  { %v364_v6 = vpop.permute.xlu0 %363 }
 0x52e   :  { %v366_v7 = vmul.f32 %v364_v6, %v349_v59 }
 0x530   :  { %368 = vrot.lane.b32.xlu1 %v366_v7, %s2626_s20 }
 0x583   :  { %v2832_v5 = vpop.f32.mrb[6].mxu0 }
 0x584   :  { %v150_v6 = vpop.f32.mrb[7].mxu0 }
 0x5a2   :  { %v369_v10 = vpop.permute.xlu1 %368 }
 0x5a3   :  { %372 = vst.msk [vmem:[#allocation3 + $0x8] sm:$0xff] %vm172_vm1, %v369_v10  ;;  %2235 = vmatmul.mubr.msk.f32.vlgmr.msra.gmra.mrb[4].mxu1 %vm172_vm1, %v369_v10 }
 0x5a4   :  { %2463 = vmatpush3.bf16.msra.mxu1 %v2695_v15  ;;  %2245 = vmatprep.mubr.msk.f32.mxu1 %vm2623_vm0, %v2624_v4 }
 0x5a5   :  { %2464 = vmatprep.subr.bf16.mxu1 %v2622_v3 }
 0x5a8   :  { %2466 = vmatpush3.bf16.msra.mxu1 %v2707_v19 }
 0x5a9   :  { %2467 = vmatprep.subr.bf16.mxu1 %v2622_v3 }
 0x676   :  { %v443_v12 = vpop.f32.mrb[4].mxu1 }
 0x677   :  { %v447_v13 = vadd.f32 %v443_v12, %v131_v11  ;;  %v2236_v14 = vpop.f32.mrb[5].mxu1 }
 0x679   :  { %2566 = vtanh.f32 %v447_v13 }
 0x683   :  { %v2567_v16 = vpop.eup %2566 }
 0x684   :  { %453 = vrot.lane.b32.xlu0 %v2567_v16, %s2625_s19  ;;  %v449_v17 = vmul.f32 0.5, %v2567_v16 }
 0x686   :  { %v450_v18 = vadd.f32 0.5, %v449_v17 }
 0x688   :  { %v451_v22 = vmul.f32 %v450_v18, %v360_v0 }
 0x6f6   :  { %v454_v20 = vpop.permute.xlu0 %453 }
 0x6f7   :  { %v456_v21 = vmul.f32 %v454_v20, %v450_v18  ;;  %v2012_v20 = vld [vmem:[%s3047_s1 + $0x80] sm:$0xff] }
 0x6f9   :  { %458 = vrot.lane.b32.xlu1 %v456_v21, %s2626_s20  ;;  %v2013_v21 = vld [vmem:[%s3047_s1 + $0x88] sm:$0xff] }
 0x76b   :  { %v459_v23 = vpop.permute.xlu1 %458 }
 0x76c   :  { %v461_v24 = vadd.f32 %v459_v23, %v451_v22  ;;  %v2491_v22 = vpack.c.bf16 %v2013_v21, %v2012_v20 }
 0x76e   :  { %2568 = vtanh.f32 %v461_v24 }
 0x778   :  { %v2569_v25 = vpop.eup %2568 }
 0x779   :  { %464 = vrot.lane.b32.xlu0 %v2569_v25, %s2625_s19 }
 0x7eb   :  { %v465_v26 = vpop.permute.xlu0 %464 }
 0x7ec   :  { %v467_v27 = vmul.f32 %v465_v26, %v450_v18  ;;  %v2014_v26 = vld [vmem:[%s3047_s1 + $0x90] sm:$0xff] }
 0x7ee   :  { %469 = vrot.lane.b32.xlu1 %v467_v27, %s2626_s20  ;;  %v2015_v27 = vld [vmem:[%s3047_s1 + $0x98] sm:$0xff] }
 0x860   :  { %v470_v28 = vpop.permute.xlu1 %469 }
 0x861   :  { %473 = vst.msk [vmem:[#allocation3 + $0x10] sm:$0xff] %vm172_vm1, %v470_v28  ;;  %2246 = vmatmul.mubr.msk.f32.vlgmr.msra.gmra.mrb[6].mxu1 %vm172_vm1, %v470_v28  ;;  %v2495_v28 = vpack.c.bf16 %v2015_v27, %v2014_v26 }
 0x862   :  { %2469 = vmatpush3.bf16.msra.mxu1 %v2695_v15  ;;  %2256 = vmatprep.mubr.msk.f32.mxu1 %vm2623_vm0, %v2624_v4 }
 0x863   :  { %2470 = vmatprep.subr.bf16.mxu1 %v2622_v3 }
 0x866   :  { %2472 = vmatpush3.bf16.msra.mxu1 %v2707_v19 }
 0x867   :  { %2479 = vmatprep.subr.bf16.mxu1 %v2622_v3 }
 0x934   :  { %v544_v30 = vpop.f32.mrb[6].mxu1 }
 0x935   :  { %v548_v31 = vadd.f32 %v544_v30, %v136_v29  ;;  %v2247_v32 = vpop.f32.mrb[7].mxu1  ;;  %v979_v30 = vld [vmem:[#allocation3] sm:$0xff] }
 0x936   :  { %v981_v32 = vld [vmem:[#allocation3 + $0x10] sm:$0xff] }
 0x937   :  { %2570 = vtanh.f32 %v548_v31  ;;  %v980_v31 = vld [vmem:[#allocation3 + $0x8] sm:$0xff] }
 0x941   :  { %v2571_v33 = vpop.eup %2570 }
 0x942   :  { %554 = vrot.lane.b32.xlu0 %v2571_v33, %s2625_s19  ;;  %v550_v34 = vmul.f32 0.5, %v2571_v33 }
 0x944   :  { %v551_v35 = vadd.f32 0.5, %v550_v34 }
 0x946   :  { %v552_v39 = vmul.f32 %v551_v35, %v461_v24 }
 0x9b4   :  { %v555_v37 = vpop.permute.xlu0 %554 }
 0x9b5   :  { %v557_v38 = vmul.f32 %v555_v37, %v551_v35  ;;  %v151_v37 = vadd.f32 %v2754_v36, %v150_v6 }
 0x9b7   :  { %559 = vrot.lane.b32.xlu1 %v557_v38, %s2626_s20 }
 0xa29   :  { %v560_v40 = vpop.permute.xlu1 %559 }
 0xa2a   :  { %v562_v41 = vadd.f32 %v560_v40, %v552_v39 }
 0xa2c   :  { %2572 = vtanh.f32 %v562_v41 }
 0xa36   :  { %v2573_v44 = vpop.eup %2572 }
 0xa37   :  { %565 = vrot.lane.b32.xlu0 %v2573_v44, %s2625_s19 }
 0xaa9   :  { %v566_v45 = vpop.permute.xlu0 %565 }
 0xaaa   :  { %v568_v46 = vmul.f32 %v566_v45, %v551_v35 }
 0xaac   :  { %570 = vrot.lane.b32.xlu1 %v568_v46, %s2626_s20 }
 0xb1e   :  { %v571_v49 = vpop.permute.xlu1 %570 }
 0xb1f   :  { %574 = vst.msk [vmem:[#allocation3 + $0x18] sm:$0xff] %vm172_vm1, %v571_v49  ;;  %2257 = vmatmul.mubr.msk.f32.vlgmr.msra.gmra.mrb[8].mxu1 %vm172_vm1, %v571_v49 }
 0xb20   :  { %2481 = vmatpush3.bf16.msra.mxu1 %v2695_v15  ;;  %2278 = vmatprep.mubr.msk.f32.mxu1 %vm2623_vm0, %v2624_v4 }
 0xb21   :  { %2482 = vmatprep.subr.bf16.mxu1 %v2622_v3 }
 0xb24   :  { %2484 = vmatpush3.bf16.msra.mxu1 %v2707_v19 }
 0xb25   :  { %2492 = vmatprep.subr.bf16.mxu1 %v2491_v22 }
 0xb26   :  { %v982_v33 = vld [vmem:[#allocation3 + $0x18] sm:$0xff] }
 0xbf2   :  { %v645_v51 = vpop.f32.mrb[8].mxu1 }
 0xbf3   :  { %v649_v52 = vadd.f32 %v645_v51, %v141_v50  ;;  %v2258_v53 = vpop.f32.mrb[9].mxu1 }
 0xbf5   :  { %2574 = vtanh.f32 %v649_v52 }
 0xbff   :  { %v2575_v54 = vpop.eup %2574 }
 0xc00   :  { %655 = vrot.lane.b32.xlu0 %v2575_v54, %s2625_s19  ;;  %v651_v55 = vmul.f32 0.5, %v2575_v54 }
 0xc02   :  { %v652_v56 = vadd.f32 0.5, %v651_v55 }
 0xc04   :  { %v653_v59 = vmul.f32 %v652_v56, %v562_v41 }
 0xc72   :  { %v656_v57 = vpop.permute.xlu0 %655 }
 0xc73   :  { %v658_v58 = vmul.f32 %v656_v57, %v652_v56  ;;  %v2027_v57 = vld [vmem:[%s3048_s2 + $0x28] sm:$0xff] }
 0xc75   :  { %660 = vrot.lane.b32.xlu1 %v658_v58, %s2626_s20 }
 0xce7   :  { %v661_v60 = vpop.permute.xlu1 %660 }
 0xce8   :  { %v663_v61 = vadd.f32 %v661_v60, %v653_v59  ;;  %v2028_v59 = vld [vmem:[%s3048_s2 + $0x30] sm:$0xff]  ;;  %v2029_v60 = vld [vmem:[%s3048_s2 + $0x38] sm:$0xff] }
 0xcea   :  { %2576 = vtanh.f32 %v663_v61 }
 0xcf4   :  { %v2577_v0 = vpop.eup %2576 }
 0xcf5   :  { %666 = vrot.lane.b32.xlu0 %v2577_v0, %s2625_s19 }
 0xd67   :  { %v667_v1 = vpop.permute.xlu0 %666 }
 0xd68   :  { %v669_v2 = vmul.f32 %v667_v1, %v652_v56  ;;  %v2026_v56 = vld [vmem:[%s3048_s2 + $0x20] sm:$0xff] }
 0xd69   :  { %v2891_v58 = vpack.c.bf16 %v2027_v57, %v2026_v56 }
 0xd6a   :  { %671 = vrot.lane.b32.xlu1 %v669_v2, %s2626_s20  ;;  %v156_v2 = vadd.f32 %v2832_v5, %v2754_v36 }
 0xddc   :  { %v672_v7 = vpop.permute.xlu1 %671 }
 0xddd   :  { %675 = vst.msk [vmem:[#allocation3 + $0x20] sm:$0xff] %vm172_vm1, %v672_v7  ;;  %2268 = vmatmul.mubr.msk.f32.vlgmr.msra.gmra.mrb[8].mxu0 %vm172_vm1, %v672_v7 }
 0xdde   :  { %2487 = vmatpush3.bf16.msra.mxu0 %v2695_v15  ;;  %2289 = vmatprep.mubr.msk.f32.mxu0 %vm2623_vm0, %v2624_v4 }
 0xddf   :  { %2488 = vmatprep.subr.bf16.mxu0 %v2622_v3 }
 0xde2   :  { %2490 = vmatpush3.bf16.msra.mxu0 %v2707_v19 }
 0xde3   :  { %2499 = vmatprep.subr.bf16.mxu0 %v2622_v3 }
 0xde4   :  { %v983_v34 = vld [vmem:[#allocation3 + $0x20] sm:$0xff] }
 0xeb0   :  { %v746_v9 = vpop.f32.mrb[8].mxu0 }
 0xeb1   :  { %v750_v10 = vadd.f32 %v746_v9, %v146_v8  ;;  %v2269_v11 = vpop.f32.mrb[9].mxu0  ;;  %v2927_v9 = vld [vmem:[%s3050_s3 + $0x1] ss:$0 sm:$0xff] }
 0xeb3   :  { %2578 = vtanh.f32 %v750_v10 }
 0xebd   :  { %v2579_v12 = vpop.eup %2578 }
 0xebe   :  { %756 = vrot.lane.b32.xlu0 %v2579_v12, %s2625_s19  ;;  %v752_v13 = vmul.f32 0.5, %v2579_v12 }
 0xec0   :  { %v753_v15 = vadd.f32 0.5, %v752_v13 }
 0xec2   :  { %v754_v17 = vmul.f32 %v753_v15, %v663_v61  ;;  %v2901_v61 = vpack.c.bf16 %v2029_v60, %v2028_v59 }
 0xf30   :  { %v757_v14 = vpop.permute.xlu0 %756 }
 0xf31   :  { %v759_v16 = vmul.f32 %v757_v14, %v753_v15 }
 0xf33   :  { %761 = vrot.lane.b32.xlu1 %v759_v16, %s2626_s20 }
 0xfa5   :  { %v762_v18 = vpop.permute.xlu1 %761 }
 0xfa6   :  { %v764_v19 = vadd.f32 %v762_v18, %v754_v17 }
 0xfa8   :  { %2580 = vtanh.f32 %v764_v19 }
 0xfb2   :  { %v2581_v23 = vpop.eup %2580 }
 0xfb3   :  { %767 = vrot.lane.b32.xlu0 %v2581_v23, %s2625_s19 }
0x1025   :  { %v768_v24 = vpop.permute.xlu0 %767 }
0x1026   :  { %v770_v25 = vmul.f32 %v768_v24, %v753_v15 }
0x1028   :  { %772 = vrot.lane.b32.xlu1 %v770_v25, %s2626_s20 }
0x109a   :  { %v773_v29 = vpop.permute.xlu1 %772 }
0x109b   :  { %776 = vst.msk [vmem:[#allocation3 + $0x28] sm:$0xff] %vm172_vm1, %v773_v29  ;;  %2279 = vmatmul.mubr.msk.f32.vlgmr.msra.gmra.mrb[10].mxu1 %vm172_vm1, %v773_v29 }
0x109c   :  { %2494 = vmatpush3.bf16.msra.mxu1 %v2491_v22  ;;  %2300 = vmatprep.mubr.msk.f32.mxu1 %vm172_vm1, %v979_v30 }
0x109d   :  { %2496 = vmatprep.subr.bf16.mxu1 %v2495_v28 }
0x10a0   :  { %2498 = vmatpush3.bf16.msra.mxu1 %v2495_v28 }
0x10a1   :  { %2511 = vmatprep.subr.bf16.mxu1 %v2622_v3 }
0x10a2   :  { %v984_v35 = vld [vmem:[#allocation3 + $0x28] sm:$0xff] }
0x10a3   :  { %2301 = vmatmul.mubr.msk.f32.vlgmr.msra.gmra.mrb[12].mxu1 %vm172_vm1, %v980_v31 }
0x10a4   :  { %2303 = vmatprep.mubr.msk.f32.mxu1 %vm172_vm1, %v981_v32  ;;  %2513 = vmatpush3.bf16.msra.mxu1 %v2891_v58 }
0x10a5   :  { %2514 = vmatprep.subr.bf16.mxu1 %v2622_v3 }
0x10a7   :  { %2304 = vmatmul.mubr.msk.f32.gmra.mrb[14].mxu1 %vm172_vm1, %v982_v33 }
0x10a8   :  { %2306 = vmatprep.mubr.msk.f32.mxu1 %vm172_vm1, %v983_v34  ;;  %2516 = vmatpush3.bf16.msra.mxu1 %v2901_v61 }
0x10a9   :  { %2523 = vmatprep.subr.bf16.mxu1 %v2622_v3 }
0x10ab   :  { %2307 = vmatmul.mubr.msk.f32.gmra.mrb[16].mxu1 %vm172_vm1, %v984_v35 }
0x116e   :  { %v847_v38 = vpop.f32.mrb[10].mxu1 }
0x116f   :  { %v851_v39 = vadd.f32 %v847_v38, %v151_v37  ;;  %v2280_v40 = vpop.f32.mrb[11].mxu1 }
0x1171   :  { %2582 = vtanh.f32 %v851_v39 }
0x1176   :  { %v2869_v41 = vpop.f32.mrb[12].mxu1 }
0x1177   :  { %v1090_v42 = vpop.f32.mrb[13].mxu1  ;;  %v1096_v35 = vadd.f32 %v2869_v41, %v2927_v9 }
0x1178   :  { %v1091_v10 = vadd.f32 %v2927_v9, %v1090_v42 }
0x117a   :  { %v2871_v43 = vpop.f32.mrb[14].mxu1 }
0x117b   :  { %v2583_v44 = vpop.eup %2582  ;;  %v2873_v45 = vpop.f32.mrb[15].mxu1 }
0x117c   :  { %857 = vrot.lane.b32.xlu0 %v2583_v44, %s2625_s19  ;;  %v853_v48 = vmul.f32 0.5, %v2583_v44 }
0x117e   :  { %v2876_v46 = vpop.f32.mrb[16].mxu1  ;;  %v854_v49 = vadd.f32 0.5, %v853_v48 }
0x117f   :  { %v2878_v47 = vpop.f32.mrb[17].mxu1 }
0x1180   :  { %v855_v52 = vmul.f32 %v854_v49, %v764_v19 }
0x11ee   :  { %v858_v50 = vpop.permute.xlu0 %857 }
0x11ef   :  { %v860_v51 = vmul.f32 %v858_v50, %v854_v49 }
0x11f1   :  { %862 = vrot.lane.b32.xlu1 %v860_v51, %s2626_s20 }
0x1263   :  { %v863_v53 = vpop.permute.xlu1 %862 }
0x1264   :  { %v2881_v54 = vadd.f32 %v863_v53, %v855_v52 }
0x1266   :  { %2584 = vtanh.f32 %v2881_v54 }
0x1270   :  { %v2585_v55 = vpop.eup %2584 }
0x1271   :  { %868 = vrot.lane.b32.xlu0 %v2585_v55, %s2625_s19 }
0x12e3   :  { %v869_v62 = vpop.permute.xlu0 %868 }
0x12e4   :  { %v871_v63 = vmul.f32 %v869_v62, %v854_v49  ;;  %v1101_v62 = vadd.f32 %v2927_v9, %v2873_v45 }
0x12e6   :  { %873 = vrot.lane.b32.xlu1 %v871_v63, %s2626_s20 }
0x1358   :  { %v874_v0 = vpop.permute.xlu1 %873 }
0x1359   :  { %877 = vst.msk [vmem:[#allocation3 + $0x30] sm:$0xff] %vm172_vm1, %v874_v0  ;;  %2290 = vmatmul.mubr.msk.f32.vlgmr.msra.gmra.mrb[10].mxu0 %vm172_vm1, %v874_v0 }
0x135a   :  { %2501 = vmatpush3.bf16.msra.mxu0 %v2891_v58  ;;  %2320 = vmatprep.mubr.msk.f32.mxu0 %vm2623_vm0, %v2624_v4 }
0x135b   :  { %2502 = vmatprep.subr.bf16.mxu0 %v2622_v3 }
0x135e   :  { %2504 = vmatpush3.bf16.msra.mxu0 %v2901_v61 }
0x135f   :  { %2505 = vmatprep.subr.bf16.mxu0 %v2622_v3 }
0x1360   :  { %v985_v1 = vld [vmem:[#allocation3 + $0x30] sm:$0xff] }
0x1361   :  { %2321 = vmatmul.mubr.f32.vlgmr.msra.gmra.mrb[12].mxu0 %v2624_v4  ;;  %2309 = vmatprep.mubr.msk.f32.mxu1 %vm172_vm1, %v985_v1 }
0x1362   :  { %2507 = vmatpush3.bf16.msra.mxu0 %v2891_v58  ;;  %2331 = vmatprep.mubr.msk.f32.mxu0 %vm2623_vm0, %v2624_v4 }
0x1363   :  { %2508 = vmatprep.subr.bf16.mxu0 %v2622_v3 }
0x1366   :  { %2510 = vmatpush3.bf16.msra.mxu0 %v2901_v61 }
0x1367   :  { %2517 = vmatprep.subr.bf16.mxu0 %v2622_v3 }
0x142c   :  { %v948_v6 = vpop.f32.mrb[10].mxu0 }
0x142d   :  { %v952_v7 = vadd.f32 %v948_v6, %v156_v2  ;;  %v2291_v8 = vpop.f32.mrb[11].mxu0 }
0x1434   :  { %v1209_v11 = vpop.f32.mrb[12].mxu0 }
0x1435   :  { %v1213_v12 = vadd.f32 %v1209_v11, %v1091_v10  ;;  %v2322_v13 = vpop.f32.mrb[13].mxu0 }
0x1437   :  { %2586 = vtanh.f32 %v1213_v12 }
0x1441   :  { %v2587_v15 = vpop.eup %2586 }
0x1442   :  { %1219 = vrot.lane.b32.xlu0 %v2587_v15, %s2625_s19  ;;  %v1215_v14 = vmul.f32 0.5, %v2587_v15 }
0x1444   :  { %v1216_v16 = vadd.f32 0.5, %v1215_v14 }
0x1446   :  { %v1217_v17 = vmul.f32 0.0, %v1216_v16 }
0x14b4   :  { %v1220_v36 = vpop.permute.xlu0 %1219 }
0x14b5   :  { %v1222_v5 = vmul.f32 %v1220_v36, %v1216_v16  ;;  %v1106_v36 = vadd.f32 %v2871_v43, %v2927_v9 }
0x14b7   :  { %1224 = vrot.lane.b32.xlu1 %v1222_v5, %s2626_s20 }
0x1529   :  { %v1225_v18 = vpop.permute.xlu1 %1224 }
0x152a   :  { %v1227_v19 = vadd.f32 %v1225_v18, %v1217_v17 }
0x152c   :  { %2588 = vtanh.f32 %v1227_v19 }
0x152d   :  { %2590 = vtanh.f32 %v952_v7 }
0x1536   :  { %v2589_v20 = vpop.eup %2588 }
0x1537   :  { %1230 = vrot.lane.b32.xlu0 %v2589_v20, %s2625_s19  ;;  %v2591_v21 = vpop.eup %2590 }
0x1538   :  { %v954_v22 = vmul.f32 0.5, %v2591_v21 }
0x153a   :  { %v955_v25 = vadd.f32 0.5, %v954_v22 }
0x153b   :  { %958 = vrot.lane.b32.xlu0 %v2591_v21, %s2625_s19 }
0x153c   :  { %v956_v29 = vmul.f32 %v955_v25, %v2881_v54 }
0x15a9   :  { %v1231_v23 = vpop.permute.xlu0 %1230 }
0x15aa   :  { %v1233_v24 = vmul.f32 %v1231_v23, %v1216_v16 }
0x15ac   :  { %1236 = vrot.lane.b32.xlu1 %v1233_v24, %s2626_s20 }
0x15ad   :  { %v959_v26 = vpop.permute.xlu0 %958 }
0x15ae   :  { %v961_v27 = vmul.f32 %v959_v26, %v955_v25 }
0x15b0   :  { %963 = vrot.lane.b32.xlu0 %v961_v27, %s2626_s20 }
0x161e   :  { %v1237_v28 = vpop.permute.xlu1 %1236 }
0x161f   :  { %2332 = vmatmul.mubr.msk.f32.vlgmr.msra.gmra.mrb[14].mxu0 %vm172_vm1, %v1237_v28 }
0x1620   :  { %2519 = vmatpush3.bf16.msra.mxu0 %v2891_v58  ;;  %2353 = vmatprep.mubr.msk.f32.mxu0 %vm2623_vm0, %v2624_v4 }
0x1621   :  { %2520 = vmatprep.subr.bf16.mxu0 %v2622_v3 }
0x1622   :  { %v964_v30 = vpop.permute.xlu0 %963 }
0x1623   :  { %v966_v31 = vadd.f32 %v964_v30, %v956_v29  ;;  %v1111_v30 = vadd.f32 %v2927_v9, %v2878_v47 }
0x1624   :  { %2522 = vmatpush3.bf16.msra.mxu0 %v2901_v61 }
0x1625   :  { %2592 = vtanh.f32 %v966_v31  ;;  %2529 = vmatprep.subr.bf16.mxu0 %v2622_v3 }
0x162f   :  { %v2593_v32 = vpop.eup %2592 }
0x1630   :  { %969 = vrot.lane.b32.xlu0 %v2593_v32, %s2625_s19 }
0x16a2   :  { %v970_v33 = vpop.permute.xlu0 %969 }
0x16a3   :  { %v972_v34 = vmul.f32 %v970_v33, %v955_v25 }
0x16a5   :  { %974 = vrot.lane.b32.xlu0 %v972_v34, %s2626_s20 }
0x16f2   :  { %v1306_v37 = vpop.f32.mrb[14].mxu0 }
0x16f3   :  { %v1310_v38 = vadd.f32 %v1306_v37, %v1096_v35  ;;  %v2333_v39 = vpop.f32.mrb[15].mxu0 }
0x16f5   :  { %2594 = vtanh.f32 %v1310_v38 }
0x16ff   :  { %v2595_v40 = vpop.eup %2594 }
0x1700   :  { %1316 = vrot.lane.b32.xlu1 %v2595_v40, %s2625_s19  ;;  %v1312_v48 = vmul.f32 0.5, %v2595_v40 }
0x1702   :  { %v1313_v49 = vadd.f32 0.5, %v1312_v48 }
0x1704   :  { %v1314_v51 = vmul.f32 %v1313_v49, %v1227_v19 }
0x1717   :  { %v975_v42 = vpop.permute.xlu0 %974 }
0x1718   :  { %978 = vst.msk [vmem:[#allocation3 + $0x38] sm:$0xff] %vm172_vm1, %v975_v42 }
0x171f   :  { %v986_v44 = vld [vmem:[#allocation3 + $0x38] sm:$0xff] }
0x1720   :  { %2310 = vmatmul.mubr.msk.f32.gmra.mrb[18].mxu1 %vm172_vm1, %v986_v44 }
0x1721   :  { %2342 = vmatprep.mubr.msk.f32.mxu1 %vm2623_vm0, %v2624_v4 }
0x1772   :  { %v1317_v50 = vpop.permute.xlu1 %1316 }
0x1773   :  { %v1319_v41 = vmul.f32 %v1317_v50, %v1313_v49 }
0x1775   :  { %1321 = vrot.lane.b32.xlu1 %v1319_v41, %s2626_s20  ;;  %v1116_v41 = vadd.f32 %v2876_v46, %v2927_v9 }
0x17e7   :  { %v1322_v52 = vpop.permute.xlu1 %1321 }
0x17e8   :  { %v1324_v53 = vadd.f32 %v1322_v52, %v1314_v51 }
0x17ea   :  { %2596 = vtanh.f32 %v1324_v53 }
0x17f3   :  { %v2954_v54 = vpop.f32.mrb[18].mxu1 }
0x17f4   :  { %v2597_v55 = vpop.eup %2596  ;;  %v2956_v56 = vpop.f32.mrb[19].mxu1 }
0x17f5   :  { %1327 = vrot.lane.b32.xlu1 %v2597_v55, %s2625_s19 }
0x1867   :  { %v1328_v57 = vpop.permute.xlu1 %1327 }
0x1868   :  { %v1330_v59 = vmul.f32 %v1328_v57, %v1313_v49 }
0x186a   :  { %1333 = vrot.lane.b32.xlu1 %v1330_v59, %s2626_s20 }
0x18dc   :  { %v1334_v60 = vpop.permute.xlu1 %1333 }
0x18dd   :  { %2343 = vmatmul.mubr.msk.f32.vlgmr.msra.gmra.mrb[20].mxu1 %vm172_vm1, %v1334_v60 }
0x18de   :  { %2525 = vmatpush3.bf16.msra.mxu1 %v2891_v58  ;;  %2364 = vmatprep.mubr.msk.f32.mxu1 %vm2623_vm0, %v2624_v4 }
0x18df   :  { %2526 = vmatprep.subr.bf16.mxu1 %v2622_v3 }
0x18e2   :  { %2528 = vmatpush3.bf16.msra.mxu1 %v2901_v61 }
0x18e3   :  { %2535 = vmatprep.subr.bf16.mxu1 %v2622_v3 }
0x19b0   :  { %v1403_v63 = vpop.f32.mrb[20].mxu1 }
0x19b1   :  { %v1407_v0 = vadd.f32 %v1403_v63, %v1101_v62  ;;  %v2344_v1 = vpop.f32.mrb[21].mxu1 }
0x19b3   :  { %2598 = vtanh.f32 %v1407_v0 }
0x19bd   :  { %v2599_v2 = vpop.eup %2598 }
0x19be   :  { %1413 = vrot.lane.b32.xlu0 %v2599_v2, %s2625_s19  ;;  %v1409_v6 = vmul.f32 0.5, %v2599_v2 }
0x19c0   :  { %v1410_v7 = vadd.f32 0.5, %v1409_v6  ;;  %v1121_v6 = vadd.f32 %v2927_v9, %v2956_v56 }
0x19c2   :  { %v1411_v11 = vmul.f32 %v1410_v7, %v1324_v53 }
0x1a30   :  { %v1414_v8 = vpop.permute.xlu0 %1413 }
0x1a31   :  { %v1416_v10 = vmul.f32 %v1414_v8, %v1410_v7 }
0x1a33   :  { %1418 = vrot.lane.b32.xlu1 %v1416_v10, %s2626_s20 }
0x1aa5   :  { %v1419_v12 = vpop.permute.xlu1 %1418 }
0x1aa6   :  { %v1421_v13 = vadd.f32 %v1419_v12, %v1411_v11 }
0x1aa8   :  { %2600 = vtanh.f32 %v1421_v13 }
0x1ab2   :  { %v2601_v15 = vpop.eup %2600 }
0x1ab3   :  { %1424 = vrot.lane.b32.xlu0 %v2601_v15, %s2625_s19 }
0x1b25   :  { %v1425_v45 = vpop.permute.xlu0 %1424 }
0x1b26   :  { %v1427_v14 = vmul.f32 %v1425_v45, %v1410_v7 }
0x1b28   :  { %1430 = vrot.lane.b32.xlu1 %v1427_v14, %s2626_s20 }
0x1b9a   :  { %v1431_v16 = vpop.permute.xlu1 %1430 }
0x1b9b   :  { %2354 = vmatmul.mubr.msk.f32.vlgmr.msra.gmra.mrb[16].mxu0 %vm172_vm1, %v1431_v16 }
0x1b9c   :  { %2531 = vmatpush3.bf16.msra.mxu0 %v2891_v58  ;;  %2375 = vmatprep.mubr.msk.f32.mxu0 %vm2623_vm0, %v2624_v4 }
0x1b9d   :  { %2532 = vmatprep.subr.bf16.mxu0 %v2622_v3 }
0x1ba0   :  { %2534 = vmatpush3.bf16.msra.mxu0 %v2901_v61 }
0x1ba1   :  { %2541 = vmatprep.subr.bf16.mxu0 %v2622_v3 }
0x1c6e   :  { %v1500_v5 = vpop.f32.mrb[16].mxu0 }
0x1c6f   :  { %v1504_v17 = vadd.f32 %v1500_v5, %v1106_v36  ;;  %v2355_v18 = vpop.f32.mrb[17].mxu0 }
0x1c70   :  { %v1126_v18 = vadd.f32 %v2954_v54, %v2927_v9  ;;  %v1913_v9 = vld [vmem:[%s3051_s4] sm:$0xff]  ;;  %v1914_v54 = vld [vmem:[%s3051_s4 + $0x8] sm:$0xff] }
0x1c71   :  { %2602 = vtanh.f32 %v1504_v17 }
0x1c7b   :  { %v2603_v19 = vpop.eup %2602 }
0x1c7c   :  { %1510 = vrot.lane.b32.xlu0 %v2603_v19, %s2625_s19  ;;  %v1506_v20 = vmul.f32 0.5, %v2603_v19 }
0x1c7e   :  { %v1507_v21 = vadd.f32 0.5, %v1506_v20 }
0x1c80   :  { %v1508_v24 = vmul.f32 %v1507_v21, %v1421_v13 }
0x1cee   :  { %v1511_v22 = vpop.permute.xlu0 %1510 }
0x1cef   :  { %v1513_v23 = vmul.f32 %v1511_v22, %v1507_v21 }
0x1cf1   :  { %1515 = vrot.lane.b32.xlu1 %v1513_v23, %s2626_s20 }
0x1d63   :  { %v1516_v25 = vpop.permute.xlu1 %1515 }
0x1d64   :  { %v1518_v26 = vadd.f32 %v1516_v25, %v1508_v24 }
0x1d66   :  { %2604 = vtanh.f32 %v1518_v26 }
0x1d70   :  { %v2605_v27 = vpop.eup %2604 }
0x1d71   :  { %1521 = vrot.lane.b32.xlu0 %v2605_v27, %s2625_s19 }
0x1de3   :  { %v1522_v43 = vpop.permute.xlu0 %1521 }
0x1de4   :  { %v1524_v28 = vmul.f32 %v1522_v43, %v1507_v21 }
0x1de6   :  { %1527 = vrot.lane.b32.xlu1 %v1524_v28, %s2626_s20 }
0x1e58   :  { %v1528_v29 = vpop.permute.xlu1 %1527 }
0x1e59   :  { %2365 = vmatmul.mubr.msk.f32.vlgmr.msra.gmra.mrb[22].mxu1 %vm172_vm1, %v1528_v29  ;;  %v1915_v29 = vld [vmem:[%s3051_s4 + $0x10] sm:$0xff] }
0x1e5a   :  { %2537 = vmatpush3.bf16.msra.mxu1 %v2891_v58  ;;  %2386 = vmatprep.mubr.msk.f32.mxu1 %vm2623_vm0, %v2624_v4 }
0x1e5b   :  { %2538 = vmatprep.subr.bf16.mxu1 %v2622_v3 }
0x1e5e   :  { %2540 = vmatpush3.bf16.msra.mxu1 %v2901_v61 }
0x1e5f   :  { %2547 = vmatprep.subr.bf16.mxu1 %v2622_v3 }
0x1f2c   :  { %v1597_v31 = vpop.f32.mrb[22].mxu1 }
0x1f2d   :  { %v1601_v32 = vadd.f32 %v1597_v31, %v1111_v30  ;;  %v2366_v33 = vpop.f32.mrb[23].mxu1  ;;  %v2548_v30 = vpack.c.bf16 %v1914_v54, %v1913_v9  ;;  %v1916_v31 = vld [vmem:[%s3051_s4 + $0x18] sm:$0xff] }
0x1f2f   :  { %2606 = vtanh.f32 %v1601_v32  ;;  %v2551_v32 = vpack.c.bf16 %v1916_v31, %v1915_v29 }
0x1f39   :  { %v2607_v34 = vpop.eup %2606 }
0x1f3a   :  { %1607 = vrot.lane.b32.xlu0 %v2607_v34, %s2625_s19  ;;  %v1603_v35 = vmul.f32 0.5, %v2607_v34 }
0x1f3c   :  { %v1604_v37 = vadd.f32 0.5, %v1603_v35 }
0x1f3e   :  { %v1605_v40 = vmul.f32 %v1604_v37, %v1518_v26 }
0x1fac   :  { %v1608_v38 = vpop.permute.xlu0 %1607 }
0x1fad   :  { %v1610_v39 = vmul.f32 %v1608_v38, %v1604_v37  ;;  %v2037_v38 = vld [vmem:[%s3052_s5] ss:$0 sm:$0xff] }
0x1faf   :  { %1612 = vrot.lane.b32.xlu1 %v1610_v39, %s2626_s20 }
0x2021   :  { %v1613_v42 = vpop.permute.xlu1 %1612 }
0x2022   :  { %v1615_v44 = vadd.f32 %v1613_v42, %v1605_v40 }
0x2024   :  { %2608 = vtanh.f32 %v1615_v44 }
0x202e   :  { %v2609_v48 = vpop.eup %2608 }
0x202f   :  { %1618 = vrot.lane.b32.xlu0 %v2609_v48, %s2625_s19 }
0x20a1   :  { %v1619_v47 = vpop.permute.xlu0 %1618 }
0x20a2   :  { %v1621_v49 = vmul.f32 %v1619_v47, %v1604_v37 }
0x20a4   :  { %1624 = vrot.lane.b32.xlu1 %v1621_v49, %s2626_s20 }
0x2116   :  { %v1625_v50 = vpop.permute.xlu1 %1624 }
0x2117   :  { %2376 = vmatmul.mubr.msk.f32.vlgmr.msra.gmra.mrb[18].mxu0 %vm172_vm1, %v1625_v50 }
0x2118   :  { %2543 = vmatpush3.bf16.msra.mxu0 %v2891_v58  ;;  %2397 = vmatprep.mubr.msk.f32.mxu0 %vm2623_vm0, %v2624_v4 }
0x2119   :  { %2544 = vmatprep.subr.bf16.mxu0 %v2622_v3 }
0x211c   :  { %2546 = vmatpush3.bf16.msra.mxu0 %v2901_v61 }
0x21ea   :  { %v1694_v51 = vpop.f32.mrb[18].mxu0 }
0x21eb   :  { %v1698_v52 = vadd.f32 %v1694_v51, %v1116_v41  ;;  %v2377_v53 = vpop.f32.mrb[19].mxu0 }
0x21ed   :  { %2610 = vtanh.f32 %v1698_v52 }
0x21f7   :  { %v2611_v55 = vpop.eup %2610 }
0x21f8   :  { %1704 = vrot.lane.b32.xlu0 %v2611_v55, %s2625_s19  ;;  %v1700_v57 = vmul.f32 0.5, %v2611_v55 }
0x21fa   :  { %v1701_v59 = vadd.f32 0.5, %v1700_v57 }
0x21fc   :  { %v1702_v62 = vmul.f32 %v1701_v59, %v1615_v44 }
0x226a   :  { %v1705_v58 = vpop.permute.xlu0 %1704 }
0x226b   :  { %v1707_v60 = vmul.f32 %v1705_v58, %v1701_v59 }
0x226d   :  { %1709 = vrot.lane.b32.xlu1 %v1707_v60, %s2626_s20 }
0x22df   :  { %v1710_v63 = vpop.permute.xlu1 %1709 }
0x22e0   :  { %v1712_v0 = vadd.f32 %v1710_v63, %v1702_v62 }
0x22e2   :  { %2612 = vtanh.f32 %v1712_v0 }
0x22ec   :  { %v2613_v61 = vpop.eup %2612 }
0x22ed   :  { %1715 = vrot.lane.b32.xlu0 %v2613_v61, %s2625_s19 }
0x235f   :  { %v1716_v46 = vpop.permute.xlu0 %1715 }
0x2360   :  { %v1718_v1 = vmul.f32 %v1716_v46, %v1701_v59 }
0x2362   :  { %1721 = vrot.lane.b32.xlu1 %v1718_v1, %s2626_s20 }
0x23d4   :  { %v1722_v2 = vpop.permute.xlu1 %1721 }
0x23d5   :  { %2387 = vmatmul.mubr.msk.f32.vlgmr.msra.gmra.mrb[24].mxu1 %vm172_vm1, %v1722_v2 }
0x23d6   :  { %2408 = vmatprep.mubr.msk.f32.mxu1 %vm2623_vm0, %v2624_v4  ;;  %2549 = vmatpush3.bf16.msra.mxu1 %v2548_v30 }
0x23d7   :  { %2550 = vmatprep.subr.bf16.mxu1 %v2622_v3 }
0x23da   :  { %2552 = vmatpush3.bf16.msra.mxu1 %v2551_v32 }
0x24a8   :  { %v1791_v7 = vpop.f32.mrb[24].mxu1 }
0x24a9   :  { %v1795_v8 = vadd.f32 %v1791_v7, %v1121_v6  ;;  %v2388_v10 = vpop.f32.mrb[25].mxu1 }
0x24ab   :  { %2614 = vtanh.f32 %v1795_v8 }
0x24b5   :  { %v2615_v11 = vpop.eup %2614 }
0x24b6   :  { %1801 = vrot.lane.b32.xlu0 %v2615_v11, %s2625_s19  ;;  %v1797_v12 = vmul.f32 0.5, %v2615_v11 }
0x24b8   :  { %v1798_v13 = vadd.f32 0.5, %v1797_v12 }
0x24ba   :  { %v1799_v14 = vmul.f32 %v1798_v13, %v1712_v0 }
0x2528   :  { %v1802_v15 = vpop.permute.xlu0 %1801 }
0x2529   :  { %v1804_v45 = vmul.f32 %v1802_v15, %v1798_v13 }
0x252b   :  { %1806 = vrot.lane.b32.xlu1 %v1804_v45, %s2626_s20 }
0x259d   :  { %v1807_v16 = vpop.permute.xlu1 %1806 }
0x259e   :  { %v1809_v36 = vadd.f32 %v1807_v16, %v1799_v14 }
0x25a0   :  { %2616 = vtanh.f32 %v1809_v36 }
0x25aa   :  { %v2617_v4 = vpop.eup %2616 }
0x25ab   :  { %1812 = vrot.lane.b32.xlu0 %v2617_v4, %s2625_s19 }
0x261d   :  { %v1813_v56 = vpop.permute.xlu0 %1812 }
0x261e   :  { %v1815_v5 = vmul.f32 %v1813_v56, %v1798_v13 }
0x2620   :  { %1818 = vrot.lane.b32.xlu1 %v1815_v5, %s2626_s20 }
0x2692   :  { %v1819_v17 = vpop.permute.xlu1 %1818 }
0x2693   :  { %2398 = vmatmul.mubr.msk.f32.vlgmr.msra.gmra.mrb[20].mxu0 %vm172_vm1, %v1819_v17 }
0x2766   :  { %v1888_v19 = vpop.f32.mrb[20].mxu0 }
0x2767   :  { %v1892_v20 = vadd.f32 %v1888_v19, %v1126_v18  ;;  %v2399_v21 = vpop.f32.mrb[21].mxu0 }
0x2769   :  { %2618 = vtanh.f32 %v1892_v20 }
0x2773   :  { %v2619_v22 = vpop.eup %2618 }
0x2774   :  { %1898 = vrot.lane.b32.xlu0 %v2619_v22, %s2625_s19  ;;  %v1894_v23 = vmul.f32 0.5, %v2619_v22 }
0x2776   :  { %v1895_v24 = vadd.f32 0.5, %v1894_v23 }
0x2778   :  { %v1896_v27 = vmul.f32 %v1895_v24, %v1809_v36 }
0x27e6   :  { %v1899_v25 = vpop.permute.xlu0 %1898 }
0x27e7   :  { %v1901_v26 = vmul.f32 %v1899_v25, %v1895_v24 }
0x27e9   :  { %1903 = vrot.lane.b32.xlu1 %v1901_v26, %s2626_s20 }
0x285b   :  { %v1904_v43 = vpop.permute.xlu1 %1903 }
0x285c   :  { %v1906_v28 = vadd.f32 %v1904_v43, %v1896_v27 }
0x285e   :  { %2620 = vtanh.f32 %v1906_v28 }
0x2868   :  { %v2621_v33 = vpop.eup %2620 }
0x2869   :  { %1909 = vrot.lane.b32.xlu0 %v2621_v33, %s2625_s19 }
0x28db   :  { %v1910_v34 = vpop.permute.xlu0 %1909 }
0x28dc   :  { %v1912_v35 = vmul.f32 %v1910_v34, %v1895_v24 }
0x28de   :  { %1925 = vrot.lane.b32.xlu1 %v1912_v35, %s2626_s20 }
0x2950   :  { %v1926_v37 = vpop.permute.xlu1 %1925 }
0x2951   :  { %2409 = vmatmul.mubr.msk.f32.vlgmr.msra.gmra.mrb[26].mxu1 %vm172_vm1, %v1926_v37 }
0x2a24   :  { %v1995_v39 = vpop.f32.mrb[26].mxu1 }
0x2a25   :  { %v1996_v40 = vadd.f32 %v2037_v38, %v1995_v39  ;;  %v2410_v42 = vpop.f32.mrb[27].mxu1 }
0x2a27   :  { %1999 = vst [vmem:[%s3053_s6] sm:$0xff] %v1996_v40 }

</bundles_post_ra>
